<compile_context>
chip_gen: v7x
topology: tpu7x:2x2x1
jax: 0.10.0
libtpu: 0.0.40
codegen_flags: <defaults>
</compile_context>

<pallas_src>
import math

import jax
import jax.numpy as jnp
from jax import lax
from jax.experimental import pallas as pl
from jax.experimental.pallas import tpu as pltpu

# ---------------- config (small synthetic Llama) ----------------
B = 2            # batch
S = 8            # sequence length (power of two -> cheap bit-op index math)
H = 32           # hidden size
NH = 4           # attention heads
HD = H // NH     # head dim
I = 64           # MLP intermediate size
V = 128          # vocab size
L = 2            # decoder layers
C = 4            # num_classes
PAD_ID = 0
EPS = 1e-6
NEG = -1e9
BF16 = jnp.bfloat16   # bnb_4bit_compute_dtype=torch.bfloat16
BS = B * S
LOG2_S = S.bit_length() - 1   # S is a power of two


# ---------------- single fused kernel: whole forward pass ----------------
def fused_forward_kernel(x_ref, km_ref, kmflat_ref, cos_ref, sin_ref,
                         rms1_ref, wqkvr_ref, wo_ref, rms2_ref, wgu_ref, wd_ref,
                         rmsf_ref, hw1_ref, hb1_ref, hw2_ref, hb2_ref,
                         o_ref):
    F32 = jnp.float32
    x = x_ref[...]                     # [B*S, H] bf16 residual stream
    km = km_ref[...]                   # [B, S]   f32 (1 = valid, 0 = pad)
    kmf = kmflat_ref[...]              # [1, B*S] f32
    cos = cos_ref[...]                 # [B*S, H] f32 (tiled per-head, per-batch)
    sin = sin_ref[...]                 # [B*S, H] f32

    # Additive attention bias over the flattened batch*seq axis, built ONCE:
    # valid iff (same batch) ∧ (causal) ∧ (key not padded); else -1e9.
    # Cross-batch entries are masked, so all batches share one score matmul.
    r = lax.broadcasted_iota(jnp.int32, (BS, BS), 0)
    c = lax.broadcasted_iota(jnp.int32, (BS, BS), 1)
    same_b = (r >> LOG2_S) == (c >> LOG2_S)            # bit ops, no vector div
    causal = (r & (S - 1)) >= (c & (S - 1))
    key_ok = kmf > 0.5                                  # [1, B*S] broadcast over rows
    bias = jnp.where(same_b & causal & key_ok, 0.0, NEG)   # [B*S, B*S] f32

    def rmsnorm(v, w):                 # v: [B*S,H] bf16, w: [1,H] bf16
        vf = v.astype(F32)
        var = jnp.mean(vf * vf, axis=-1, keepdims=True)
        return (vf * lax.rsqrt(var + EPS) * w.astype(F32)).astype(BF16)

    dn_qk = (((1,), (1,)), ((), ()))   # contract last dims: [q,d] x [k,d] -> [q,k]

    for l in range(L):                 # unrolled: L is tiny and static
        # -------- attention block --------
        h = rmsnorm(x, rms1_ref[l])                                         # [B*S,H]
        qkv = jnp.dot(h, wqkvr_ref[l], preferred_element_type=F32)          # [B*S,5H]
        q = qkv[:, 0 * H:1 * H]
        k = qkv[:, 1 * H:2 * H]
        v = qkv[:, 2 * H:3 * H]
        rq = qkv[:, 3 * H:4 * H]       # rotate_half(q): columns pre-permuted in weights
        rk = qkv[:, 4 * H:5 * H]       # rotate_half(k)
        qr = (q * cos + rq * sin).astype(BF16)   # RoPE; 1/sqrt(HD) folded into wq
        kr = (k * cos + rk * sin).astype(BF16)
        vb = v.astype(BF16)

        # per-head scores over the flattened batch axis (cross-batch masked out)
        scores = []
        for hh in range(NH):
            qh = qr[:, hh * HD:(hh + 1) * HD]                               # [B*S,HD]
            kh = kr[:, hh * HD:(hh + 1) * HD]
            s_h = lax.dot_general(qh, kh, dn_qk, preferred_element_type=F32)
            scores.append(s_h + bias)                                       # [B*S,B*S]
        s_cat = jnp.concatenate(scores, axis=0)                             # [NH*B*S,B*S]

        # softmax batched across all heads at once
        s_cat = s_cat - jnp.max(s_cat, axis=-1, keepdims=True)
        p_cat = jnp.exp(s_cat)
        p_cat = p_cat * pl.reciprocal(jnp.sum(p_cat, axis=-1, keepdims=True),
                                      approx=True)
        p_cat = p_cat.astype(BF16)

        outs = []
        for hh in range(NH):
            p_h = p_cat[hh * BS:(hh + 1) * BS, :]                           # [B*S,B*S]
            v_h = vb[:, hh * HD:(hh + 1) * HD]                              # [B*S,HD]
            outs.append(jnp.dot(p_h, v_h, preferred_element_type=F32))
        attn = jnp.concatenate(outs, axis=-1).astype(BF16)                  # [B*S,H]
        proj = jnp.dot(attn, wo_ref[l], preferred_element_type=F32)
        x = x + proj.astype(BF16)

        # -------- MLP block (SwiGLU, fused gate|up -> lane-dense [.,128]) --------
        h = rmsnorm(x, rms2_ref[l])                                         # [B*S,H]
        gu = jnp.dot(h, wgu_ref[l], preferred_element_type=F32)             # [B*S,2I]
        g = gu[:, :I]
        u = gu[:, I:]
        mh = (g * jax.nn.sigmoid(g) * u).astype(BF16)                       # [B*S,I]
        mlp = jnp.dot(mh, wd_ref[l], preferred_element_type=F32)
        x = x + mlp.astype(BF16)

    # -------- final RMSNorm + last-non-pad-token pooling (one-hot matmul) --------
    hidden = rmsnorm(x, rmsf_ref[...])                                      # [B*S,H] bf16
    n_valid = jnp.sum(km, axis=-1, keepdims=True)                           # [B,1] f32
    bi = lax.broadcasted_iota(jnp.int32, (B, BS), 0)
    ci = lax.broadcasted_iota(jnp.int32, (B, BS), 1)
    sel = (((ci >> LOG2_S) == bi) &
           ((ci & (S - 1)).astype(F32) == (n_valid - 1.0))).astype(BF16)    # [B,B*S]
    pooled = jnp.dot(sel, hidden, preferred_element_type=F32)               # [B,H] f32

    # -------- head: Dropout(identity) -> Linear -> Tanh -> Dropout(identity) -> Linear
    h1 = jnp.tanh(jnp.dot(pooled, hw1_ref[...],
                          preferred_element_type=F32) + hb1_ref[...])
    o_ref[...] = jnp.dot(h1, hw2_ref[...],
                         preferred_element_type=F32) + hb2_ref[...]


_N_INPUTS = 16
fused_forward = pl.pallas_call(
    fused_forward_kernel,
    out_shape=jax.ShapeDtypeStruct((B, C), jnp.float32),
    in_specs=[pl.BlockSpec(memory_space=pltpu.MemorySpace.VMEM)] * _N_INPUTS,
    out_specs=pl.BlockSpec(memory_space=pltpu.MemorySpace.VMEM),
)


# ---------------- rotary embedding tables (constants) ----------------
def rope_cos_sin(seq, dim, base=10000.0):
    inv = 1.0 / (base ** (jnp.arange(0, dim, 2, dtype=jnp.float32) / dim))
    t = jnp.arange(seq, dtype=jnp.float32)
    freqs = jnp.outer(t, inv)                                # [S, dim/2]
    emb = jnp.concatenate([freqs, freqs], axis=-1)           # [S, dim]
    return jnp.cos(emb), jnp.sin(emb)


def _rotate_half_cols(w):
    """Permute+negate output columns of a [H,H] projection so that
    (h @ w_rot) == rotate_half(h @ w) with per-head rotate-half (exact)."""
    parts = []
    for hh in range(NH):
        w1 = w[:, hh * HD: hh * HD + HD // 2]
        w2 = w[:, hh * HD + HD // 2: (hh + 1) * HD]
        parts += [-w2, w1]
    return jnp.concatenate(parts, axis=-1)


# ---------------- parameters (deterministic synthetic init) ----------------
def init_params(key):
    # TODO(synk): NF4 double-quantization (BitsAndBytes) and LoRA adapters are
    # not modeled; weights are plain bf16 (the dequantized compute dtype).
    def nrm(k, shape):
        return jax.random.normal(k, shape, jnp.float32) * 0.02

    keys = iter(jax.random.split(key, 64))
    embed = nrm(next(keys), (V, H)).astype(BF16)
    inv_sqrt_hd = 1.0 / math.sqrt(HD)
    wqkvr, wo, wgu, wd = [], [], [], []
    for _ in range(L):
        wq = nrm(next(keys), (H, H)) * inv_sqrt_hd     # fold 1/sqrt(head_dim) into q-proj
        wk = nrm(next(keys), (H, H))
        wv = nrm(next(keys), (H, H))
        # fused projection emits [q | k | v | rot_half(q) | rot_half(k)]
        wqkvr.append(jnp.concatenate(
            [wq, wk, wv, _rotate_half_cols(wq), _rotate_half_cols(wk)],
            axis=-1).astype(BF16))                     # [H, 5H]
        wo.append(nrm(next(keys), (H, H)).astype(BF16))
        wg = nrm(next(keys), (H, I))
        wu = nrm(next(keys), (H, I))
        wgu.append(jnp.concatenate([wg, wu], axis=-1).astype(BF16))  # [H, 2I] = [32,128]
        wd.append(nrm(next(keys), (I, H)).astype(BF16))
    cos, sin = rope_cos_sin(S, HD)                     # [S, HD]
    cos_bs = jnp.tile(jnp.tile(cos, (1, NH)), (B, 1))  # [B*S, H]
    sin_bs = jnp.tile(jnp.tile(sin, (1, NH)), (B, 1))
    return {
        "embed": embed,
        "rope_cos": cos_bs,
        "rope_sin": sin_bs,
        "rms1": jnp.ones((L, 1, H), BF16),
        "wqkvr": jnp.stack(wqkvr),      # [L, H, 5H]
        "wo": jnp.stack(wo),            # [L, H, H]
        "rms2": jnp.ones((L, 1, H), BF16),
        "wgu": jnp.stack(wgu),          # [L, H, 2I]
        "wd": jnp.stack(wd),            # [L, I, H]
        "rms_final": jnp.ones((1, H), BF16),
        # head kept in float32 (matches output[0].type(torch.float32) in PyTorch)
        "hw1": nrm(next(keys), (H, H)),
        "hb1": jnp.zeros((1, H), jnp.float32),
        "hw2": nrm(next(keys), (H, C)),
        "hb2": jnp.zeros((1, C), jnp.float32),
    }


# ---------------- forward pass ----------------
def model_forward(params, input_ids, attention_mask):
    # token embedding gather stays in XLA (single op); everything else is fused.
    x = jnp.take(params["embed"], input_ids, axis=0).reshape(B * S, H)   # bf16
    km = attention_mask.astype(jnp.float32)                              # [B, S]
    kmflat = km.reshape(1, B * S)                                        # [1, B*S]
    # TODO(synk): both Dropout layers are identity here (deterministic / eval).
    return fused_forward(
        x, km, kmflat, params["rope_cos"], params["rope_sin"],
        params["rms1"], params["wqkvr"], params["wo"], params["rms2"],
        params["wgu"], params["wd"],
        params["rms_final"], params["hw1"], params["hb1"],
        params["hw2"], params["hb2"],
    )


# ---------------- main ----------------
if __name__ == "__main__":
    key = jax.random.PRNGKey(0)
    kp, ki = jax.random.split(key)
    params = init_params(kp)

    input_ids = jax.random.randint(ki, (B, S), 1, V, dtype=jnp.int32)
    attention_mask = jnp.ones((B, S), dtype=jnp.int32)
    attention_mask = attention_mask.at[1, S - 2:].set(0)      # pad tail of 2nd sequence
    input_ids = jnp.where(attention_mask == 1, input_ids, PAD_ID)

    fwd = jax.jit(model_forward)
    logits = fwd(params, input_ids, attention_mask)
    jax.block_until_ready(logits)
    assert logits.shape == (B, C) and logits.dtype == jnp.float32
    assert bool(jnp.all(jnp.isfinite(logits)))
    print("KERNEL_OK")
</pallas_src>

<mosaic_0001>
module attributes {stable_mosaic.version = 11 : i64} {
  func.func @fused_forward_kernel(%arg0: memref<16x32xbf16, #tpu.memory_space<vmem>>, %arg1: memref<2x8xf32, #tpu.memory_space<vmem>>, %arg2: memref<1x16xf32, #tpu.memory_space<vmem>>, %arg3: memref<16x32xf32, #tpu.memory_space<vmem>>, %arg4: memref<16x32xf32, #tpu.memory_space<vmem>>, %arg5: memref<2x1x32xbf16, #tpu.memory_space<vmem>>, %arg6: memref<2x32x160xbf16, #tpu.memory_space<vmem>>, %arg7: memref<2x32x32xbf16, #tpu.memory_space<vmem>>, %arg8: memref<2x1x32xbf16, #tpu.memory_space<vmem>>, %arg9: memref<2x32x128xbf16, #tpu.memory_space<vmem>>, %arg10: memref<2x64x32xbf16, #tpu.memory_space<vmem>>, %arg11: memref<1x32xbf16, #tpu.memory_space<vmem>>, %arg12: memref<32x32xf32, #tpu.memory_space<vmem>>, %arg13: memref<1x32xf32, #tpu.memory_space<vmem>>, %arg14: memref<32x4xf32, #tpu.memory_space<vmem>>, %arg15: memref<1x4xf32, #tpu.memory_space<vmem>>, %arg16: memref<2x4xf32, #tpu.memory_space<vmem>>) attributes {dimension_semantics = [], scalar_prefetch = 0 : i64, scratch_operands = 0 : i64, tpu.core_type = #tpu.core_type<tc>} {
    %c0 = arith.constant 0 : index
    %c0_0 = arith.constant 0 : index
    %0 = vector.load %arg0[%c0, %c0_0] : memref<16x32xbf16, #tpu.memory_space<vmem>>, vector<16x32xbf16>
    %c0_1 = arith.constant 0 : index
    %c0_2 = arith.constant 0 : index
    %1 = vector.load %arg1[%c0_1, %c0_2] : memref<2x8xf32, #tpu.memory_space<vmem>>, vector<2x8xf32>
    %c0_3 = arith.constant 0 : index
    %c0_4 = arith.constant 0 : index
    %2 = vector.load %arg2[%c0_3, %c0_4] : memref<1x16xf32, #tpu.memory_space<vmem>>, vector<1x16xf32>
    %c0_5 = arith.constant 0 : index
    %c0_6 = arith.constant 0 : index
    %3 = vector.load %arg3[%c0_5, %c0_6] : memref<16x32xf32, #tpu.memory_space<vmem>>, vector<16x32xf32>
    %c0_7 = arith.constant 0 : index
    %c0_8 = arith.constant 0 : index
    %4 = vector.load %arg4[%c0_7, %c0_8] : memref<16x32xf32, #tpu.memory_space<vmem>>, vector<16x32xf32>
    %5 = tpu.iota {dimensions = array<i32: 0>} : vector<16x16xi32>
    %6 = tpu.iota {dimensions = array<i32: 1>} : vector<16x16xi32>
    %c3_i32 = arith.constant 3 : i32
    %7 = vector.broadcast %c3_i32 : i32 to vector<16x16xi32>
    %8 = arith.shrsi %5, %7 : vector<16x16xi32>
    %c3_i32_9 = arith.constant 3 : i32
    %9 = vector.broadcast %c3_i32_9 : i32 to vector<16x16xi32>
    %10 = arith.shrsi %6, %9 : vector<16x16xi32>
    %11 = arith.cmpi eq, %8, %10 : vector<16x16xi32>
    %c7_i32 = arith.constant 7 : i32
    %12 = vector.broadcast %c7_i32 : i32 to vector<16x16xi32>
    %13 = arith.andi %5, %12 : vector<16x16xi32>
    %c7_i32_10 = arith.constant 7 : i32
    %14 = vector.broadcast %c7_i32_10 : i32 to vector<16x16xi32>
    %15 = arith.andi %6, %14 : vector<16x16xi32>
    %16 = arith.cmpi sge, %13, %15 : vector<16x16xi32>
    %cst = arith.constant 5.000000e-01 : f32
    %17 = vector.broadcast %cst : f32 to vector<1x16xf32>
    %18 = arith.cmpf ogt, %2, %17 : vector<1x16xf32>
    %19 = arith.andi %11, %16 : vector<16x16xi1>
    %20 = vector.broadcast %18 : vector<1x16xi1> to vector<16x16xi1>
    %21 = arith.andi %19, %20 : vector<16x16xi1>
    %cst_11 = arith.constant 0.000000e+00 : f32
    %cst_12 = arith.constant -1.000000e+09 : f32
    %22 = vector.broadcast %cst_11 : f32 to vector<16x16xf32>
    %23 = vector.broadcast %cst_12 : f32 to vector<16x16xf32>
    %24 = arith.select %21, %22, %23 : vector<16x16xi1>, vector<16x16xf32>
    %c0_13 = arith.constant 0 : index
    %c0_14 = arith.constant 0 : index
    %c0_15 = arith.constant 0 : index
    %25 = vector.load %arg5[%c0_13, %c0_14, %c0_15] : memref<2x1x32xbf16, #tpu.memory_space<vmem>>, vector<1x1x32xbf16>
    %26 = vector.shape_cast %25 : vector<1x1x32xbf16> to vector<1x32xbf16>
    %27 = arith.extf %0 : vector<16x32xbf16> to vector<16x32xf32>
    %28 = arith.mulf %27, %27 : vector<16x32xf32>
    %cst_16 = arith.constant dense<0.000000e+00> : vector<16xf32>
    %29 = vector.multi_reduction <add>, %28, %cst_16 [1] : vector<16x32xf32> to vector<16xf32>
    %30 = vector.shape_cast %29 : vector<16xf32> to vector<16x1xf32>
    %cst_17 = arith.constant 3.200000e+01 : f32
    %31 = vector.broadcast %cst_17 : f32 to vector<16x1xf32>
    %32 = arith.divf %30, %31 : vector<16x1xf32>
    %cst_18 = arith.constant 9.99999997E-7 : f32
    %33 = vector.broadcast %cst_18 : f32 to vector<16x1xf32>
    %34 = arith.addf %32, %33 : vector<16x1xf32>
    %35 = math.rsqrt %34 : vector<16x1xf32>
    %36 = vector.broadcast %35 : vector<16x1xf32> to vector<16x32xf32>
    %37 = arith.mulf %27, %36 : vector<16x32xf32>
    %38 = arith.extf %26 : vector<1x32xbf16> to vector<1x32xf32>
    %39 = vector.broadcast %38 : vector<1x32xf32> to vector<16x32xf32>
    %40 = arith.mulf %37, %39 : vector<16x32xf32>
    %41 = arith.truncf %40 : vector<16x32xf32> to vector<16x32xbf16>
    %c0_19 = arith.constant 0 : index
    %c0_20 = arith.constant 0 : index
    %c0_21 = arith.constant 0 : index
    %42 = vector.load %arg6[%c0_19, %c0_20, %c0_21] : memref<2x32x160xbf16, #tpu.memory_space<vmem>>, vector<1x32x160xbf16>
    %43 = vector.shape_cast %42 : vector<1x32x160xbf16> to vector<32x160xbf16>
    %cst_22 = arith.constant dense<0.000000e+00> : vector<16x160xf32>
    %44 = tpu.matmul %41, %43, %cst_22 {dimension_numbers = #tpu.dot_dimension_numbers<[1], [0], [0], [1], [0, 0, 1, 1], [], []>} : vector<16x32xbf16>, vector<32x160xbf16>, vector<16x160xf32> -> vector<16x160xf32>
    %45 = vector.extract_strided_slice %44 {offsets = [0, 0], sizes = [16, 32], strides = [1, 1]} : vector<16x160xf32> to vector<16x32xf32>
    %46 = vector.extract_strided_slice %44 {offsets = [0, 32], sizes = [16, 32], strides = [1, 1]} : vector<16x160xf32> to vector<16x32xf32>
    %47 = vector.extract_strided_slice %44 {offsets = [0, 64], sizes = [16, 32], strides = [1, 1]} : vector<16x160xf32> to vector<16x32xf32>
    %48 = vector.extract_strided_slice %44 {offsets = [0, 96], sizes = [16, 32], strides = [1, 1]} : vector<16x160xf32> to vector<16x32xf32>
    %49 = vector.extract_strided_slice %44 {offsets = [0, 128], sizes = [16, 32], strides = [1, 1]} : vector<16x160xf32> to vector<16x32xf32>
    %50 = arith.mulf %45, %3 : vector<16x32xf32>
    %51 = arith.mulf %48, %4 : vector<16x32xf32>
    %52 = arith.addf %50, %51 : vector<16x32xf32>
    %53 = arith.truncf %52 : vector<16x32xf32> to vector<16x32xbf16>
    %54 = arith.mulf %46, %3 : vector<16x32xf32>
    %55 = arith.mulf %49, %4 : vector<16x32xf32>
    %56 = arith.addf %54, %55 : vector<16x32xf32>
    %57 = arith.truncf %56 : vector<16x32xf32> to vector<16x32xbf16>
    %58 = arith.truncf %47 : vector<16x32xf32> to vector<16x32xbf16>
    %59 = vector.extract_strided_slice %53 {offsets = [0, 0], sizes = [16, 8], strides = [1, 1]} : vector<16x32xbf16> to vector<16x8xbf16>
    %60 = vector.extract_strided_slice %57 {offsets = [0, 0], sizes = [16, 8], strides = [1, 1]} : vector<16x32xbf16> to vector<16x8xbf16>
    %cst_23 = arith.constant dense<0.000000e+00> : vector<16x16xf32>
    %61 = tpu.matmul %59, %60, %cst_23 {dimension_numbers = #tpu.dot_dimension_numbers<[1], [1], [0], [0], [0, 0, 1, 0], [], []>} : vector<16x8xbf16>, vector<16x8xbf16>, vector<16x16xf32> -> vector<16x16xf32>
    %62 = arith.addf %61, %24 : vector<16x16xf32>
    %63 = vector.extract_strided_slice %53 {offsets = [0, 8], sizes = [16, 8], strides = [1, 1]} : vector<16x32xbf16> to vector<16x8xbf16>
    %64 = vector.extract_strided_slice %57 {offsets = [0, 8], sizes = [16, 8], strides = [1, 1]} : vector<16x32xbf16> to vector<16x8xbf16>
    %cst_24 = arith.constant dense<0.000000e+00> : vector<16x16xf32>
    %65 = tpu.matmul %63, %64, %cst_24 {dimension_numbers = #tpu.dot_dimension_numbers<[1], [1], [0], [0], [0, 0, 1, 0], [], []>} : vector<16x8xbf16>, vector<16x8xbf16>, vector<16x16xf32> -> vector<16x16xf32>
    %66 = arith.addf %65, %24 : vector<16x16xf32>
    %67 = vector.extract_strided_slice %53 {offsets = [0, 16], sizes = [16, 8], strides = [1, 1]} : vector<16x32xbf16> to vector<16x8xbf16>
    %68 = vector.extract_strided_slice %57 {offsets = [0, 16], sizes = [16, 8], strides = [1, 1]} : vector<16x32xbf16> to vector<16x8xbf16>
    %cst_25 = arith.constant dense<0.000000e+00> : vector<16x16xf32>
    %69 = tpu.matmul %67, %68, %cst_25 {dimension_numbers = #tpu.dot_dimension_numbers<[1], [1], [0], [0], [0, 0, 1, 0], [], []>} : vector<16x8xbf16>, vector<16x8xbf16>, vector<16x16xf32> -> vector<16x16xf32>
    %70 = arith.addf %69, %24 : vector<16x16xf32>
    %71 = vector.extract_strided_slice %53 {offsets = [0, 24], sizes = [16, 8], strides = [1, 1]} : vector<16x32xbf16> to vector<16x8xbf16>
    %72 = vector.extract_strided_slice %57 {offsets = [0, 24], sizes = [16, 8], strides = [1, 1]} : vector<16x32xbf16> to vector<16x8xbf16>
    %cst_26 = arith.constant dense<0.000000e+00> : vector<16x16xf32>
    %73 = tpu.matmul %71, %72, %cst_26 {dimension_numbers = #tpu.dot_dimension_numbers<[1], [1], [0], [0], [0, 0, 1, 0], [], []>} : vector<16x8xbf16>, vector<16x8xbf16>, vector<16x16xf32> -> vector<16x16xf32>
    %74 = arith.addf %73, %24 : vector<16x16xf32>
    %75 = tpu.concatenate %62, %66, %70, %74 in 0 : vector<16x16xf32>, vector<16x16xf32>, vector<16x16xf32>, vector<16x16xf32> -> vector<64x16xf32>
    %cst_27 = arith.constant dense<0xFF800000> : vector<64xf32>
    %76 = vector.multi_reduction <maximumf>, %75, %cst_27 [1] : vector<64x16xf32> to vector<64xf32>
    %77 = vector.shape_cast %76 : vector<64xf32> to vector<64x1xf32>
    %78 = vector.broadcast %77 : vector<64x1xf32> to vector<64x16xf32>
    %79 = arith.subf %75, %78 : vector<64x16xf32>
    %80 = math.exp %79 : vector<64x16xf32>
    %cst_28 = arith.constant dense<0.000000e+00> : vector<64xf32>
    %81 = vector.multi_reduction <add>, %80, %cst_28 [1] : vector<64x16xf32> to vector<64xf32>
    %82 = vector.shape_cast %81 : vector<64xf32> to vector<64x1xf32>
    %83 = tpu.reciprocal %82 {approx = true} : vector<64x1xf32> -> vector<64x1xf32>
    %84 = vector.broadcast %83 : vector<64x1xf32> to vector<64x16xf32>
    %85 = arith.mulf %80, %84 : vector<64x16xf32>
    %86 = arith.truncf %85 : vector<64x16xf32> to vector<64x16xbf16>
    %87 = vector.extract_strided_slice %86 {offsets = [0, 0], sizes = [16, 16], strides = [1, 1]} : vector<64x16xbf16> to vector<16x16xbf16>
    %88 = vector.extract_strided_slice %58 {offsets = [0, 0], sizes = [16, 8], strides = [1, 1]} : vector<16x32xbf16> to vector<16x8xbf16>
    %cst_29 = arith.constant dense<0.000000e+00> : vector<16x8xf32>
    %89 = tpu.matmul %87, %88, %cst_29 {dimension_numbers = #tpu.dot_dimension_numbers<[1], [0], [0], [1], [0, 0, 1, 1], [], []>} : vector<16x16xbf16>, vector<16x8xbf16>, vector<16x8xf32> -> vector<16x8xf32>
    %90 = vector.extract_strided_slice %86 {offsets = [16, 0], sizes = [16, 16], strides = [1, 1]} : vector<64x16xbf16> to vector<16x16xbf16>
    %91 = vector.extract_strided_slice %58 {offsets = [0, 8], sizes = [16, 8], strides = [1, 1]} : vector<16x32xbf16> to vector<16x8xbf16>
    %cst_30 = arith.constant dense<0.000000e+00> : vector<16x8xf32>
    %92 = tpu.matmul %90, %91, %cst_30 {dimension_numbers = #tpu.dot_dimension_numbers<[1], [0], [0], [1], [0, 0, 1, 1], [], []>} : vector<16x16xbf16>, vector<16x8xbf16>, vector<16x8xf32> -> vector<16x8xf32>
    %93 = vector.extract_strided_slice %86 {offsets = [32, 0], sizes = [16, 16], strides = [1, 1]} : vector<64x16xbf16> to vector<16x16xbf16>
    %94 = vector.extract_strided_slice %58 {offsets = [0, 16], sizes = [16, 8], strides = [1, 1]} : vector<16x32xbf16> to vector<16x8xbf16>
    %cst_31 = arith.constant dense<0.000000e+00> : vector<16x8xf32>
    %95 = tpu.matmul %93, %94, %cst_31 {dimension_numbers = #tpu.dot_dimension_numbers<[1], [0], [0], [1], [0, 0, 1, 1], [], []>} : vector<16x16xbf16>, vector<16x8xbf16>, vector<16x8xf32> -> vector<16x8xf32>
    %96 = vector.extract_strided_slice %86 {offsets = [48, 0], sizes = [16, 16], strides = [1, 1]} : vector<64x16xbf16> to vector<16x16xbf16>
    %97 = vector.extract_strided_slice %58 {offsets = [0, 24], sizes = [16, 8], strides = [1, 1]} : vector<16x32xbf16> to vector<16x8xbf16>
    %cst_32 = arith.constant dense<0.000000e+00> : vector<16x8xf32>
    %98 = tpu.matmul %96, %97, %cst_32 {dimension_numbers = #tpu.dot_dimension_numbers<[1], [0], [0], [1], [0, 0, 1, 1], [], []>} : vector<16x16xbf16>, vector<16x8xbf16>, vector<16x8xf32> -> vector<16x8xf32>
    %99 = tpu.concatenate %89, %92, %95, %98 in 1 : vector<16x8xf32>, vector<16x8xf32>, vector<16x8xf32>, vector<16x8xf32> -> vector<16x32xf32>
    %100 = arith.truncf %99 : vector<16x32xf32> to vector<16x32xbf16>
    %c0_33 = arith.constant 0 : index
    %c0_34 = arith.constant 0 : index
    %c0_35 = arith.constant 0 : index
    %101 = vector.load %arg7[%c0_33, %c0_34, %c0_35] : memref<2x32x32xbf16, #tpu.memory_space<vmem>>, vector<1x32x32xbf16>
    %102 = vector.shape_cast %101 : vector<1x32x32xbf16> to vector<32x32xbf16>
    %cst_36 = arith.constant dense<0.000000e+00> : vector<16x32xf32>
    %103 = tpu.matmul %100, %102, %cst_36 {dimension_numbers = #tpu.dot_dimension_numbers<[1], [0], [0], [1], [0, 0, 1, 1], [], []>} : vector<16x32xbf16>, vector<32x32xbf16>, vector<16x32xf32> -> vector<16x32xf32>
    %104 = arith.truncf %103 : vector<16x32xf32> to vector<16x32xbf16>
    %105 = arith.addf %0, %104 : vector<16x32xbf16>
    %c0_37 = arith.constant 0 : index
    %c0_38 = arith.constant 0 : index
    %c0_39 = arith.constant 0 : index
    %106 = vector.load %arg8[%c0_37, %c0_38, %c0_39] : memref<2x1x32xbf16, #tpu.memory_space<vmem>>, vector<1x1x32xbf16>
    %107 = vector.shape_cast %106 : vector<1x1x32xbf16> to vector<1x32xbf16>
    %108 = arith.extf %105 : vector<16x32xbf16> to vector<16x32xf32>
    %109 = arith.mulf %108, %108 : vector<16x32xf32>
    %cst_40 = arith.constant dense<0.000000e+00> : vector<16xf32>
    %110 = vector.multi_reduction <add>, %109, %cst_40 [1] : vector<16x32xf32> to vector<16xf32>
    %111 = vector.shape_cast %110 : vector<16xf32> to vector<16x1xf32>
    %cst_41 = arith.constant 3.200000e+01 : f32
    %112 = vector.broadcast %cst_41 : f32 to vector<16x1xf32>
    %113 = arith.divf %111, %112 : vector<16x1xf32>
    %cst_42 = arith.constant 9.99999997E-7 : f32
    %114 = vector.broadcast %cst_42 : f32 to vector<16x1xf32>
    %115 = arith.addf %113, %114 : vector<16x1xf32>
    %116 = math.rsqrt %115 : vector<16x1xf32>
    %117 = vector.broadcast %116 : vector<16x1xf32> to vector<16x32xf32>
    %118 = arith.mulf %108, %117 : vector<16x32xf32>
    %119 = arith.extf %107 : vector<1x32xbf16> to vector<1x32xf32>
    %120 = vector.broadcast %119 : vector<1x32xf32> to vector<16x32xf32>
    %121 = arith.mulf %118, %120 : vector<16x32xf32>
    %122 = arith.truncf %121 : vector<16x32xf32> to vector<16x32xbf16>
    %c0_43 = arith.constant 0 : index
    %c0_44 = arith.constant 0 : index
    %c0_45 = arith.constant 0 : index
    %123 = vector.load %arg9[%c0_43, %c0_44, %c0_45] : memref<2x32x128xbf16, #tpu.memory_space<vmem>>, vector<1x32x128xbf16>
    %124 = vector.shape_cast %123 : vector<1x32x128xbf16> to vector<32x128xbf16>
    %cst_46 = arith.constant dense<0.000000e+00> : vector<16x128xf32>
    %125 = tpu.matmul %122, %124, %cst_46 {dimension_numbers = #tpu.dot_dimension_numbers<[1], [0], [0], [1], [0, 0, 1, 1], [], []>} : vector<16x32xbf16>, vector<32x128xbf16>, vector<16x128xf32> -> vector<16x128xf32>
    %126 = vector.extract_strided_slice %125 {offsets = [0, 0], sizes = [16, 64], strides = [1, 1]} : vector<16x128xf32> to vector<16x64xf32>
    %127 = vector.extract_strided_slice %125 {offsets = [0, 64], sizes = [16, 64], strides = [1, 1]} : vector<16x128xf32> to vector<16x64xf32>
    %128 = arith.negf %126 : vector<16x64xf32>
    %129 = math.exp %128 : vector<16x64xf32>
    %cst_47 = arith.constant 1.000000e+00 : f32
    %130 = vector.broadcast %cst_47 : f32 to vector<16x64xf32>
    %131 = arith.addf %130, %129 : vector<16x64xf32>
    %132 = arith.divf %130, %131 : vector<16x64xf32>
    %133 = arith.mulf %126, %132 : vector<16x64xf32>
    %134 = arith.mulf %133, %127 : vector<16x64xf32>
    %135 = arith.truncf %134 : vector<16x64xf32> to vector<16x64xbf16>
    %c0_48 = arith.constant 0 : index
    %c0_49 = arith.constant 0 : index
    %c0_50 = arith.constant 0 : index
    %136 = vector.load %arg10[%c0_48, %c0_49, %c0_50] : memref<2x64x32xbf16, #tpu.memory_space<vmem>>, vector<1x64x32xbf16>
    %137 = vector.shape_cast %136 : vector<1x64x32xbf16> to vector<64x32xbf16>
    %cst_51 = arith.constant dense<0.000000e+00> : vector<16x32xf32>
    %138 = tpu.matmul %135, %137, %cst_51 {dimension_numbers = #tpu.dot_dimension_numbers<[1], [0], [0], [1], [0, 0, 1, 1], [], []>} : vector<16x64xbf16>, vector<64x32xbf16>, vector<16x32xf32> -> vector<16x32xf32>
    %139 = arith.truncf %138 : vector<16x32xf32> to vector<16x32xbf16>
    %140 = arith.addf %105, %139 : vector<16x32xbf16>
    %c1 = arith.constant 1 : index
    %c0_52 = arith.constant 0 : index
    %c0_53 = arith.constant 0 : index
    %141 = vector.load %arg5[%c1, %c0_52, %c0_53] : memref<2x1x32xbf16, #tpu.memory_space<vmem>>, vector<1x1x32xbf16>
    %142 = vector.shape_cast %141 : vector<1x1x32xbf16> to vector<1x32xbf16>
    %143 = arith.extf %140 : vector<16x32xbf16> to vector<16x32xf32>
    %144 = arith.mulf %143, %143 : vector<16x32xf32>
    %cst_54 = arith.constant dense<0.000000e+00> : vector<16xf32>
    %145 = vector.multi_reduction <add>, %144, %cst_54 [1] : vector<16x32xf32> to vector<16xf32>
    %146 = vector.shape_cast %145 : vector<16xf32> to vector<16x1xf32>
    %cst_55 = arith.constant 3.200000e+01 : f32
    %147 = vector.broadcast %cst_55 : f32 to vector<16x1xf32>
    %148 = arith.divf %146, %147 : vector<16x1xf32>
    %cst_56 = arith.constant 9.99999997E-7 : f32
    %149 = vector.broadcast %cst_56 : f32 to vector<16x1xf32>
    %150 = arith.addf %148, %149 : vector<16x1xf32>
    %151 = math.rsqrt %150 : vector<16x1xf32>
    %152 = vector.broadcast %151 : vector<16x1xf32> to vector<16x32xf32>
    %153 = arith.mulf %143, %152 : vector<16x32xf32>
    %154 = arith.extf %142 : vector<1x32xbf16> to vector<1x32xf32>
    %155 = vector.broadcast %154 : vector<1x32xf32> to vector<16x32xf32>
    %156 = arith.mulf %153, %155 : vector<16x32xf32>
    %157 = arith.truncf %156 : vector<16x32xf32> to vector<16x32xbf16>
    %c1_57 = arith.constant 1 : index
    %c0_58 = arith.constant 0 : index
    %c0_59 = arith.constant 0 : index
    %158 = vector.load %arg6[%c1_57, %c0_58, %c0_59] : memref<2x32x160xbf16, #tpu.memory_space<vmem>>, vector<1x32x160xbf16>
    %159 = vector.shape_cast %158 : vector<1x32x160xbf16> to vector<32x160xbf16>
    %cst_60 = arith.constant dense<0.000000e+00> : vector<16x160xf32>
    %160 = tpu.matmul %157, %159, %cst_60 {dimension_numbers = #tpu.dot_dimension_numbers<[1], [0], [0], [1], [0, 0, 1, 1], [], []>} : vector<16x32xbf16>, vector<32x160xbf16>, vector<16x160xf32> -> vector<16x160xf32>
    %161 = vector.extract_strided_slice %160 {offsets = [0, 0], sizes = [16, 32], strides = [1, 1]} : vector<16x160xf32> to vector<16x32xf32>
    %162 = vector.extract_strided_slice %160 {offsets = [0, 32], sizes = [16, 32], strides = [1, 1]} : vector<16x160xf32> to vector<16x32xf32>
    %163 = vector.extract_strided_slice %160 {offsets = [0, 64], sizes = [16, 32], strides = [1, 1]} : vector<16x160xf32> to vector<16x32xf32>
    %164 = vector.extract_strided_slice %160 {offsets = [0, 96], sizes = [16, 32], strides = [1, 1]} : vector<16x160xf32> to vector<16x32xf32>
    %165 = vector.extract_strided_slice %160 {offsets = [0, 128], sizes = [16, 32], strides = [1, 1]} : vector<16x160xf32> to vector<16x32xf32>
    %166 = arith.mulf %161, %3 : vector<16x32xf32>
    %167 = arith.mulf %164, %4 : vector<16x32xf32>
    %168 = arith.addf %166, %167 : vector<16x32xf32>
    %169 = arith.truncf %168 : vector<16x32xf32> to vector<16x32xbf16>
    %170 = arith.mulf %162, %3 : vector<16x32xf32>
    %171 = arith.mulf %165, %4 : vector<16x32xf32>
    %172 = arith.addf %170, %171 : vector<16x32xf32>
    %173 = arith.truncf %172 : vector<16x32xf32> to vector<16x32xbf16>
    %174 = arith.truncf %163 : vector<16x32xf32> to vector<16x32xbf16>
    %175 = vector.extract_strided_slice %169 {offsets = [0, 0], sizes = [16, 8], strides = [1, 1]} : vector<16x32xbf16> to vector<16x8xbf16>
    %176 = vector.extract_strided_slice %173 {offsets = [0, 0], sizes = [16, 8], strides = [1, 1]} : vector<16x32xbf16> to vector<16x8xbf16>
    %cst_61 = arith.constant dense<0.000000e+00> : vector<16x16xf32>
    %177 = tpu.matmul %175, %176, %cst_61 {dimension_numbers = #tpu.dot_dimension_numbers<[1], [1], [0], [0], [0, 0, 1, 0], [], []>} : vector<16x8xbf16>, vector<16x8xbf16>, vector<16x16xf32> -> vector<16x16xf32>
    %178 = arith.addf %177, %24 : vector<16x16xf32>
    %179 = vector.extract_strided_slice %169 {offsets = [0, 8], sizes = [16, 8], strides = [1, 1]} : vector<16x32xbf16> to vector<16x8xbf16>
    %180 = vector.extract_strided_slice %173 {offsets = [0, 8], sizes = [16, 8], strides = [1, 1]} : vector<16x32xbf16> to vector<16x8xbf16>
    %cst_62 = arith.constant dense<0.000000e+00> : vector<16x16xf32>
    %181 = tpu.matmul %179, %180, %cst_62 {dimension_numbers = #tpu.dot_dimension_numbers<[1], [1], [0], [0], [0, 0, 1, 0], [], []>} : vector<16x8xbf16>, vector<16x8xbf16>, vector<16x16xf32> -> vector<16x16xf32>
    %182 = arith.addf %181, %24 : vector<16x16xf32>
    %183 = vector.extract_strided_slice %169 {offsets = [0, 16], sizes = [16, 8], strides = [1, 1]} : vector<16x32xbf16> to vector<16x8xbf16>
    %184 = vector.extract_strided_slice %173 {offsets = [0, 16], sizes = [16, 8], strides = [1, 1]} : vector<16x32xbf16> to vector<16x8xbf16>
    %cst_63 = arith.constant dense<0.000000e+00> : vector<16x16xf32>
    %185 = tpu.matmul %183, %184, %cst_63 {dimension_numbers = #tpu.dot_dimension_numbers<[1], [1], [0], [0], [0, 0, 1, 0], [], []>} : vector<16x8xbf16>, vector<16x8xbf16>, vector<16x16xf32> -> vector<16x16xf32>
    %186 = arith.addf %185, %24 : vector<16x16xf32>
    %187 = vector.extract_strided_slice %169 {offsets = [0, 24], sizes = [16, 8], strides = [1, 1]} : vector<16x32xbf16> to vector<16x8xbf16>
    %188 = vector.extract_strided_slice %173 {offsets = [0, 24], sizes = [16, 8], strides = [1, 1]} : vector<16x32xbf16> to vector<16x8xbf16>
    %cst_64 = arith.constant dense<0.000000e+00> : vector<16x16xf32>
    %189 = tpu.matmul %187, %188, %cst_64 {dimension_numbers = #tpu.dot_dimension_numbers<[1], [1], [0], [0], [0, 0, 1, 0], [], []>} : vector<16x8xbf16>, vector<16x8xbf16>, vector<16x16xf32> -> vector<16x16xf32>
    %190 = arith.addf %189, %24 : vector<16x16xf32>
    %191 = tpu.concatenate %178, %182, %186, %190 in 0 : vector<16x16xf32>, vector<16x16xf32>, vector<16x16xf32>, vector<16x16xf32> -> vector<64x16xf32>
    %cst_65 = arith.constant dense<0xFF800000> : vector<64xf32>
    %192 = vector.multi_reduction <maximumf>, %191, %cst_65 [1] : vector<64x16xf32> to vector<64xf32>
    %193 = vector.shape_cast %192 : vector<64xf32> to vector<64x1xf32>
    %194 = vector.broadcast %193 : vector<64x1xf32> to vector<64x16xf32>
    %195 = arith.subf %191, %194 : vector<64x16xf32>
    %196 = math.exp %195 : vector<64x16xf32>
    %cst_66 = arith.constant dense<0.000000e+00> : vector<64xf32>
    %197 = vector.multi_reduction <add>, %196, %cst_66 [1] : vector<64x16xf32> to vector<64xf32>
    %198 = vector.shape_cast %197 : vector<64xf32> to vector<64x1xf32>
    %199 = tpu.reciprocal %198 {approx = true} : vector<64x1xf32> -> vector<64x1xf32>
    %200 = vector.broadcast %199 : vector<64x1xf32> to vector<64x16xf32>
    %201 = arith.mulf %196, %200 : vector<64x16xf32>
    %202 = arith.truncf %201 : vector<64x16xf32> to vector<64x16xbf16>
    %203 = vector.extract_strided_slice %202 {offsets = [0, 0], sizes = [16, 16], strides = [1, 1]} : vector<64x16xbf16> to vector<16x16xbf16>
    %204 = vector.extract_strided_slice %174 {offsets = [0, 0], sizes = [16, 8], strides = [1, 1]} : vector<16x32xbf16> to vector<16x8xbf16>
    %cst_67 = arith.constant dense<0.000000e+00> : vector<16x8xf32>
    %205 = tpu.matmul %203, %204, %cst_67 {dimension_numbers = #tpu.dot_dimension_numbers<[1], [0], [0], [1], [0, 0, 1, 1], [], []>} : vector<16x16xbf16>, vector<16x8xbf16>, vector<16x8xf32> -> vector<16x8xf32>
    %206 = vector.extract_strided_slice %202 {offsets = [16, 0], sizes = [16, 16], strides = [1, 1]} : vector<64x16xbf16> to vector<16x16xbf16>
    %207 = vector.extract_strided_slice %174 {offsets = [0, 8], sizes = [16, 8], strides = [1, 1]} : vector<16x32xbf16> to vector<16x8xbf16>
    %cst_68 = arith.constant dense<0.000000e+00> : vector<16x8xf32>
    %208 = tpu.matmul %206, %207, %cst_68 {dimension_numbers = #tpu.dot_dimension_numbers<[1], [0], [0], [1], [0, 0, 1, 1], [], []>} : vector<16x16xbf16>, vector<16x8xbf16>, vector<16x8xf32> -> vector<16x8xf32>
    %209 = vector.extract_strided_slice %202 {offsets = [32, 0], sizes = [16, 16], strides = [1, 1]} : vector<64x16xbf16> to vector<16x16xbf16>
    %210 = vector.extract_strided_slice %174 {offsets = [0, 16], sizes = [16, 8], strides = [1, 1]} : vector<16x32xbf16> to vector<16x8xbf16>
    %cst_69 = arith.constant dense<0.000000e+00> : vector<16x8xf32>
    %211 = tpu.matmul %209, %210, %cst_69 {dimension_numbers = #tpu.dot_dimension_numbers<[1], [0], [0], [1], [0, 0, 1, 1], [], []>} : vector<16x16xbf16>, vector<16x8xbf16>, vector<16x8xf32> -> vector<16x8xf32>
    %212 = vector.extract_strided_slice %202 {offsets = [48, 0], sizes = [16, 16], strides = [1, 1]} : vector<64x16xbf16> to vector<16x16xbf16>
    %213 = vector.extract_strided_slice %174 {offsets = [0, 24], sizes = [16, 8], strides = [1, 1]} : vector<16x32xbf16> to vector<16x8xbf16>
    %cst_70 = arith.constant dense<0.000000e+00> : vector<16x8xf32>
    %214 = tpu.matmul %212, %213, %cst_70 {dimension_numbers = #tpu.dot_dimension_numbers<[1], [0], [0], [1], [0, 0, 1, 1], [], []>} : vector<16x16xbf16>, vector<16x8xbf16>, vector<16x8xf32> -> vector<16x8xf32>
    %215 = tpu.concatenate %205, %208, %211, %214 in 1 : vector<16x8xf32>, vector<16x8xf32>, vector<16x8xf32>, vector<16x8xf32> -> vector<16x32xf32>
    %216 = arith.truncf %215 : vector<16x32xf32> to vector<16x32xbf16>
    %c1_71 = arith.constant 1 : index
    %c0_72 = arith.constant 0 : index
    %c0_73 = arith.constant 0 : index
    %217 = vector.load %arg7[%c1_71, %c0_72, %c0_73] : memref<2x32x32xbf16, #tpu.memory_space<vmem>>, vector<1x32x32xbf16>
    %218 = vector.shape_cast %217 : vector<1x32x32xbf16> to vector<32x32xbf16>
    %cst_74 = arith.constant dense<0.000000e+00> : vector<16x32xf32>
    %219 = tpu.matmul %216, %218, %cst_74 {dimension_numbers = #tpu.dot_dimension_numbers<[1], [0], [0], [1], [0, 0, 1, 1], [], []>} : vector<16x32xbf16>, vector<32x32xbf16>, vector<16x32xf32> -> vector<16x32xf32>
    %220 = arith.truncf %219 : vector<16x32xf32> to vector<16x32xbf16>
    %221 = arith.addf %140, %220 : vector<16x32xbf16>
    %c1_75 = arith.constant 1 : index
    %c0_76 = arith.constant 0 : index
    %c0_77 = arith.constant 0 : index
    %222 = vector.load %arg8[%c1_75, %c0_76, %c0_77] : memref<2x1x32xbf16, #tpu.memory_space<vmem>>, vector<1x1x32xbf16>
    %223 = vector.shape_cast %222 : vector<1x1x32xbf16> to vector<1x32xbf16>
    %224 = arith.extf %221 : vector<16x32xbf16> to vector<16x32xf32>
    %225 = arith.mulf %224, %224 : vector<16x32xf32>
    %cst_78 = arith.constant dense<0.000000e+00> : vector<16xf32>
    %226 = vector.multi_reduction <add>, %225, %cst_78 [1] : vector<16x32xf32> to vector<16xf32>
    %227 = vector.shape_cast %226 : vector<16xf32> to vector<16x1xf32>
    %cst_79 = arith.constant 3.200000e+01 : f32
    %228 = vector.broadcast %cst_79 : f32 to vector<16x1xf32>
    %229 = arith.divf %227, %228 : vector<16x1xf32>
    %cst_80 = arith.constant 9.99999997E-7 : f32
    %230 = vector.broadcast %cst_80 : f32 to vector<16x1xf32>
    %231 = arith.addf %229, %230 : vector<16x1xf32>
    %232 = math.rsqrt %231 : vector<16x1xf32>
    %233 = vector.broadcast %232 : vector<16x1xf32> to vector<16x32xf32>
    %234 = arith.mulf %224, %233 : vector<16x32xf32>
    %235 = arith.extf %223 : vector<1x32xbf16> to vector<1x32xf32>
    %236 = vector.broadcast %235 : vector<1x32xf32> to vector<16x32xf32>
    %237 = arith.mulf %234, %236 : vector<16x32xf32>
    %238 = arith.truncf %237 : vector<16x32xf32> to vector<16x32xbf16>
    %c1_81 = arith.constant 1 : index
    %c0_82 = arith.constant 0 : index
    %c0_83 = arith.constant 0 : index
    %239 = vector.load %arg9[%c1_81, %c0_82, %c0_83] : memref<2x32x128xbf16, #tpu.memory_space<vmem>>, vector<1x32x128xbf16>
    %240 = vector.shape_cast %239 : vector<1x32x128xbf16> to vector<32x128xbf16>
    %cst_84 = arith.constant dense<0.000000e+00> : vector<16x128xf32>
    %241 = tpu.matmul %238, %240, %cst_84 {dimension_numbers = #tpu.dot_dimension_numbers<[1], [0], [0], [1], [0, 0, 1, 1], [], []>} : vector<16x32xbf16>, vector<32x128xbf16>, vector<16x128xf32> -> vector<16x128xf32>
    %242 = vector.extract_strided_slice %241 {offsets = [0, 0], sizes = [16, 64], strides = [1, 1]} : vector<16x128xf32> to vector<16x64xf32>
    %243 = vector.extract_strided_slice %241 {offsets = [0, 64], sizes = [16, 64], strides = [1, 1]} : vector<16x128xf32> to vector<16x64xf32>
    %244 = arith.negf %242 : vector<16x64xf32>
    %245 = math.exp %244 : vector<16x64xf32>
    %cst_85 = arith.constant 1.000000e+00 : f32
    %246 = vector.broadcast %cst_85 : f32 to vector<16x64xf32>
    %247 = arith.addf %246, %245 : vector<16x64xf32>
    %248 = arith.divf %246, %247 : vector<16x64xf32>
    %249 = arith.mulf %242, %248 : vector<16x64xf32>
    %250 = arith.mulf %249, %243 : vector<16x64xf32>
    %251 = arith.truncf %250 : vector<16x64xf32> to vector<16x64xbf16>
    %c1_86 = arith.constant 1 : index
    %c0_87 = arith.constant 0 : index
    %c0_88 = arith.constant 0 : index
    %252 = vector.load %arg10[%c1_86, %c0_87, %c0_88] : memref<2x64x32xbf16, #tpu.memory_space<vmem>>, vector<1x64x32xbf16>
    %253 = vector.shape_cast %252 : vector<1x64x32xbf16> to vector<64x32xbf16>
    %cst_89 = arith.constant dense<0.000000e+00> : vector<16x32xf32>
    %254 = tpu.matmul %251, %253, %cst_89 {dimension_numbers = #tpu.dot_dimension_numbers<[1], [0], [0], [1], [0, 0, 1, 1], [], []>} : vector<16x64xbf16>, vector<64x32xbf16>, vector<16x32xf32> -> vector<16x32xf32>
    %255 = arith.truncf %254 : vector<16x32xf32> to vector<16x32xbf16>
    %256 = arith.addf %221, %255 : vector<16x32xbf16>
    %c0_90 = arith.constant 0 : index
    %c0_91 = arith.constant 0 : index
    %257 = vector.load %arg11[%c0_90, %c0_91] : memref<1x32xbf16, #tpu.memory_space<vmem>>, vector<1x32xbf16>
    %258 = arith.extf %256 : vector<16x32xbf16> to vector<16x32xf32>
    %259 = arith.mulf %258, %258 : vector<16x32xf32>
    %cst_92 = arith.constant dense<0.000000e+00> : vector<16xf32>
    %260 = vector.multi_reduction <add>, %259, %cst_92 [1] : vector<16x32xf32> to vector<16xf32>
    %261 = vector.shape_cast %260 : vector<16xf32> to vector<16x1xf32>
    %cst_93 = arith.constant 3.200000e+01 : f32
    %262 = vector.broadcast %cst_93 : f32 to vector<16x1xf32>
    %263 = arith.divf %261, %262 : vector<16x1xf32>
    %cst_94 = arith.constant 9.99999997E-7 : f32
    %264 = vector.broadcast %cst_94 : f32 to vector<16x1xf32>
    %265 = arith.addf %263, %264 : vector<16x1xf32>
    %266 = math.rsqrt %265 : vector<16x1xf32>
    %267 = vector.broadcast %266 : vector<16x1xf32> to vector<16x32xf32>
    %268 = arith.mulf %258, %267 : vector<16x32xf32>
    %269 = arith.extf %257 : vector<1x32xbf16> to vector<1x32xf32>
    %270 = vector.broadcast %269 : vector<1x32xf32> to vector<16x32xf32>
    %271 = arith.mulf %268, %270 : vector<16x32xf32>
    %272 = arith.truncf %271 : vector<16x32xf32> to vector<16x32xbf16>
    %cst_95 = arith.constant dense<0.000000e+00> : vector<2xf32>
    %273 = vector.multi_reduction <add>, %1, %cst_95 [1] : vector<2x8xf32> to vector<2xf32>
    %274 = vector.shape_cast %273 : vector<2xf32> to vector<2x1xf32>
    %275 = tpu.iota {dimensions = array<i32: 0>} : vector<2x16xi32>
    %276 = tpu.iota {dimensions = array<i32: 1>} : vector<2x16xi32>
    %c3_i32_96 = arith.constant 3 : i32
    %277 = vector.broadcast %c3_i32_96 : i32 to vector<2x16xi32>
    %278 = arith.shrsi %276, %277 : vector<2x16xi32>
    %279 = arith.cmpi eq, %278, %275 : vector<2x16xi32>
    %c7_i32_97 = arith.constant 7 : i32
    %280 = vector.broadcast %c7_i32_97 : i32 to vector<2x16xi32>
    %281 = arith.andi %276, %280 : vector<2x16xi32>
    %282 = arith.sitofp %281 : vector<2x16xi32> to vector<2x16xf32>
    %cst_98 = arith.constant 1.000000e+00 : f32
    %283 = vector.broadcast %cst_98 : f32 to vector<2x1xf32>
    %284 = arith.subf %274, %283 : vector<2x1xf32>
    %285 = vector.broadcast %284 : vector<2x1xf32> to vector<2x16xf32>
    %286 = arith.cmpf oeq, %282, %285 : vector<2x16xf32>
    %287 = arith.andi %279, %286 : vector<2x16xi1>
    %288 = arith.extui %287 : vector<2x16xi1> to vector<2x16xi32>
    %289 = arith.sitofp %288 : vector<2x16xi32> to vector<2x16xf32>
    %290 = arith.truncf %289 : vector<2x16xf32> to vector<2x16xbf16>
    %cst_99 = arith.constant dense<0.000000e+00> : vector<2x32xf32>
    %291 = tpu.matmul %290, %272, %cst_99 {dimension_numbers = #tpu.dot_dimension_numbers<[1], [0], [0], [1], [0, 0, 1, 1], [], []>} : vector<2x16xbf16>, vector<16x32xbf16>, vector<2x32xf32> -> vector<2x32xf32>
    %c0_100 = arith.constant 0 : index
    %c0_101 = arith.constant 0 : index
    %292 = vector.load %arg12[%c0_100, %c0_101] : memref<32x32xf32, #tpu.memory_space<vmem>>, vector<32x32xf32>
    %cst_102 = arith.constant dense<0.000000e+00> : vector<2x32xf32>
    %293 = tpu.matmul %291, %292, %cst_102 {dimension_numbers = #tpu.dot_dimension_numbers<[1], [0], [0], [1], [0, 0, 1, 1], [], []>} : vector<2x32xf32>, vector<32x32xf32>, vector<2x32xf32> -> vector<2x32xf32>
    %c0_103 = arith.constant 0 : index
    %c0_104 = arith.constant 0 : index
    %294 = vector.load %arg13[%c0_103, %c0_104] : memref<1x32xf32, #tpu.memory_space<vmem>>, vector<1x32xf32>
    %295 = vector.broadcast %294 : vector<1x32xf32> to vector<2x32xf32>
    %296 = arith.addf %293, %295 : vector<2x32xf32>
    %297 = math.tanh %296 : vector<2x32xf32>
    %c0_105 = arith.constant 0 : index
    %c0_106 = arith.constant 0 : index
    %298 = vector.load %arg14[%c0_105, %c0_106] : memref<32x4xf32, #tpu.memory_space<vmem>>, vector<32x4xf32>
    %cst_107 = arith.constant dense<0.000000e+00> : vector<2x4xf32>
    %299 = tpu.matmul %297, %298, %cst_107 {dimension_numbers = #tpu.dot_dimension_numbers<[1], [0], [0], [1], [0, 0, 1, 1], [], []>} : vector<2x32xf32>, vector<32x4xf32>, vector<2x4xf32> -> vector<2x4xf32>
    %c0_108 = arith.constant 0 : index
    %c0_109 = arith.constant 0 : index
    %300 = vector.load %arg15[%c0_108, %c0_109] : memref<1x4xf32, #tpu.memory_space<vmem>>, vector<1x4xf32>
    %301 = vector.broadcast %300 : vector<1x4xf32> to vector<2x4xf32>
    %302 = arith.addf %299, %301 : vector<2x4xf32>
    %c0_110 = arith.constant 0 : index
    %c0_111 = arith.constant 0 : index
    %303 = vector.load %arg16[%c0_110, %c0_111] : memref<2x4xf32, #tpu.memory_space<vmem>>, vector<2x4xf32>
    tpu.vector_store %arg16[%c0_110, %c0_111], %302 {strides = array<i32>} : memref<2x4xf32, #tpu.memory_space<vmem>>, vector<2x4xf32>,
    return
  }
}

</mosaic_0001>

<bundles_post_ra>
// kernel: model_forward.1
= control target key start
LH: loop header
LB: loop body
LE: loop exit
PB: predicated region body
PF: predicated region fallthrough
CT: control target
= control target key end

     0   :  { %s3376_s0 = inlined_call_operand.vmem [shape: bf16[16,32], index: 0, kind: input, shape index: {}]   ;;  %s3377_s1 = inlined_call_operand.vmem [shape: f32[2,8], index: 1, kind: input, shape index: {}]   ;;  %s3378_s2 = inlined_call_operand.vmem [shape: f32[1,16], index: 2, kind: input, shape index: {}]   ;;  %s3379_s3 = inlined_call_operand.vmem [shape: f32[16,32], index: 3, kind: input, shape index: {}]   ;;  %s3380_s4 = inlined_call_operand.vmem [shape: f32[16,32], index: 4, kind: input, shape index: {}]   ;;  %s3381_s5 = inlined_call_operand.vmem [shape: bf16[2,1,32], index: 5, kind: input, shape index: {}]   ;;  %s3382_s6 = inlined_call_operand.vmem [shape: bf16[2,32,160], index: 6, kind: input, shape index: {}]   ;;  %s3383_s7 = inlined_call_operand.vmem [shape: bf16[2,32,32], index: 7, kind: input, shape index: {}]   ;;  %s3384_s8 = inlined_call_operand.vmem [shape: bf16[2,1,32], index: 8, kind: input, shape index: {}]   ;;  %s3385_s9 = inlined_call_operand.vmem [shape: bf16[2,32,128], index: 9, kind: input, shape index: {}]   ;;  %s3386_s10 = inlined_call_operand.vmem [shape: bf16[2,64,32], index: 10, kind: input, shape index: {}]   ;;  %s3387_s11 = inlined_call_operand.vmem [shape: bf16[1,32], index: 11, kind: input, shape index: {}]   ;;  %s3388_s12 = inlined_call_operand.vmem [shape: f32[32,32], index: 12, kind: input, shape index: {}]   ;;  %s3389_s13 = inlined_call_operand.vmem [shape: f32[1,32], index: 13, kind: input, shape index: {}]   ;;  %s3390_s14 = inlined_call_operand.vmem [shape: f32[32,4], index: 14, kind: input, shape index: {}]   ;;  %s3391_s15 = inlined_call_operand.vmem [shape: f32[1,4], index: 15, kind: input, shape index: {}]   ;;  %s3392_s16 = inlined_call_operand.hbm [shape: f32[2,4], index: 16, kind: output, shape index: {}]  }
   0x1   :  { %3399 = sst [smem:[#allocation5_spill]] %s3376_s0 }
   0x2   :  { %s3400_s23 = sld [smem:[#allocation5_spill]]  ;;  %vm96_vm0 = vcmask 261120  }
   0x8   :  { %v2879_v0 = vld [vmem:[%s3400_s23] sm:$0xf]  ;;  %v2884_v1 = vld [vmem:[%s3400_s23 + $0x4] sm:$0xf] }
   0x9   :  { %v92_v2 = vunpack.c.l.bf16 %v2879_v0  ;;  %v93_v3 = vunpack.c.l.bf16 %v2884_v1 }
   0xb   :  { %v94_v4 = vmul.f32 %v92_v2, %v92_v2  ;;  %v95_v5 = vmul.f32 %v93_v3, %v93_v3 }
   0xd   :  { %v97_v6 = vsel %vm96_vm0, %v94_v4, 0.0  ;;  %v100_v7 = vsel %vm96_vm0, %v95_v5, 0.0 }
   0xe   :  { %98 = vadd.xlane.f32.xlu0 %v97_v6 }
  0x12   :  { %101 = vadd.xlane.f32.xlu0 %v100_v7 }
  0x13   :  { %21 = vsyncpa [#allocation3], 0  ;;  %v2616_v8 = vld [vmem:[%s3382_s6 + $0x4] ss:$8 sps:$4 sm:$0xff]   ;;  %v2618_v9 = vld [vmem:[%s3382_s6] ss:$8 sps:$4 sm:$0xff]   ;;  %v63_v22 = vlaneseq }
  0x14   :  { %v2619_v10 = vld [vmem:[%s3382_s6 + $0x14] ss:$8 sps:$4 sm:$0xff]   ;;  %147 = vmatprep.subr.bf16.mxu0 %v2616_v8  ;;  %v2770_v11 = vmov 0   ;;  %v2621_v12 = vld [vmem:[%s3382_s6 + $0x10] ss:$8 sps:$4 sm:$0xff]   ;;  %v2906_v13 = vld [vmem:[%s3380_s4] sm:$0xff] }
  0x15   :  { %179 = vmatprep.mubr.bf16.mxu0 %v2770_v11  ;;  %148 = vmatpush1.bf16.msra.mxu0 %v2618_v9  ;;  %v2911_v14 = vld [vmem:[%s3379_s3] sm:$0xff]  ;;  %s2771_s23 = smov 96   ;;  %s2772_s24 = smov 32   ;;  %v2920_v15 = vld [vmem:[%s3380_s4 + $0x8] sm:$0xff]  ;;  %v2932_v24 = vshrl.u32 %v63_v22, 7  ;;  %v2773_v48 = vmov 0.0  }
  0x16   :  { %149 = vmatprep.subr.bf16.mxu0 %v2619_v10  ;;  %194 = vrot.lane.b32.xlu1 %v2906_v13, %s2771_s23  ;;  %v2927_v16 = vld [vmem:[%s3379_s3 + $0x8] sm:$0xff]  ;;  %v91_v25 = vld [vmem:[%s3381_s5] sm:$0x1]  ;;  %vm2774_vm1 = vmmov 0   ;;  %s2775_s3 = smov 88   ;;  %s2776_s30 = smov 80  }
  0x17   :  { %v2938_v26 = vsub.s32 0, %v2932_v24  ;;  %v112_v27 = vunpack.c.l.bf16 %v91_v25  ;;  %2373 = vmatprep.subr.bf16.mxu1 %v2773_v48  ;;  %2375 = vmatprep.mubr.msk.bf16.mxu1 %vm2774_vm1, %v2773_v48  ;;  %s2777_s0 = smov 120   ;;  %s2778_s17 = smov 72   ;;  %vm240_vm2 = vcmask 64512   ;;  %vm442_vm13 = vcmask 130048  }
  0x18   :  { %s2779_s18 = smov 112   ;;  %s2780_s19 = smov 104   ;;  %vm752_vm14 = vcmask 195584   ;;  %vm970_vm15 = vcmask 523264  }
  0x19   :  { %150 = vmatpush1.bf16.msra.mxu0 %v2621_v12  ;;  %v116_v30 = vrot.slane %v112_v27, %v2938_v26  ;;  %v73_v27 = vand.u32 7, %v2932_v24  ;;  %s2783_s22 = smov 48   ;;  %s3398_s25 = smov 40  }
  0x1a   :  { %196 = vrot.lane.b32.xlu1 %v2920_v15, %s2771_s23  ;;  %2379 = vmatprep.subr.bf16.mxu0 %v2773_v48  ;;  %s3397_s26 = smov 56   ;;  %s3396_s20 = smov 8  }
  0x1b   :  { %s3395_s21 = smov 16   ;;  %s3394_s27 = smov 24  }
  0x1e   :  { %217 = vrot.lane.b32.xlu1 %v2927_v16, %s2772_s24 }
  0x28   :  { %215 = vrot.lane.b32.xlu0 %v2911_v14, %s2772_s24 }
  0x88   :  { %v2947_v43 = vpop.permute.xlu1 %194 }
  0x8c   :  { %v2952_v45 = vpop.permute.xlu1 %196 }
  0x90   :  { %v2956_v47 = vpop.permute.xlu1 %217 }
  0x9b   :  { %v99_v17 = vpop.xlane.xlu0 %98 }
  0x9c   :  { %v104_v18 = vmul.f32 0.03125, %v99_v17 }
  0x9e   :  { %v106_v19 = vadd.f32 1e-06, %v104_v18  ;;  %v58_v18 = vld [vmem:[%s3378_s2] sm:$0x1]  ;;  %s2782_s2 = smov 64  }
  0x9f   :  { %v102_v20 = vpop.xlane.xlu0 %101  ;;  %vm78_vm3 = vcmp.gt.f32.partialorder %v58_v18, 0.5 }
  0xa0   :  { %2644 = vrsqrt.f32 %v106_v19  ;;  %v105_v21 = vmul.f32 0.03125, %v102_v20  ;;  %v67_v19 = vand.u32 127, %v63_v22  ;;  %v65_v20 = vadd.s32 8, %v2932_v24 }
  0xa1   :  { %v2781_v22 = vmov -1e+09  }
  0xa2   :  { %v107_v23 = vadd.f32 1e-06, %v105_v21  ;;  %v81_v21 = vsel %vm78_vm3, 1, %v2770_v11  ;;  %v3004_v25 = vshra.s32 %v67_v19, 3 }
  0xa3   :  { %v2960_v49 = vpop.permute.xlu0 %215 }
  0xa4   :  { %2646 = vrsqrt.f32 %v107_v23  ;;  %v68_v23 = vshra.s32 %v2932_v24, 3  ;;  %vm1974_vm3 = vcmp.eq.s32.totalorder %v3004_v25, %v2932_v24  ;;  %v2026_v24 = vld [vmem:[%s3388_s12 + $0x8] sm:$0xff] }
  0xa6   :  { %vm71_vm4 = vcmp.eq.s32.totalorder %v68_v23, %v3004_v25 }
  0xaa   :  { %v2645_v28 = vpop.eup %2644 }
  0xab   :  { %v110_v29 = vmul.f32 %v2645_v28, %v92_v2  ;;  %v3007_v28 = vand.u32 7, %v67_v19 }
  0xad   :  { %v117_v33 = vmul.f32 %v116_v30, %v110_v29  ;;  %v69_v29 = vshra.s32 %v65_v20, 3  ;;  %vm76_vm5 = vcmp.ge.s32.totalorder %v73_v27, %v3007_v28 }
  0xae   :  { %v2647_v31 = vpop.eup %2646  ;;  %vm79_vm8 = vmand %vm71_vm4, %vm76_vm5 }
  0xaf   :  { %v111_v32 = vmul.f32 %v2647_v31, %v93_v3  ;;  %v85_v31 = vrot.slane %v81_v21, %v2938_v26  ;;  %vm72_vm6 = vcmp.eq.s32.totalorder %v69_v29, %v3004_v25 }
  0xb1   :  { %v118_v34 = vmul.f32 %v116_v30, %v111_v32  ;;  %v74_v30 = vand.u32 7, %v65_v20  ;;  %vm86_vm9 = vcmp.eq.s32.totalorder %v85_v31, 1 }
  0xb2   :  { %vm87_vm11 = vmand %vm79_vm8, %vm86_vm9 }
  0xb3   :  { %v119_v35 = vpack.c.bf16 %v118_v34, %v117_v33  ;;  %vm77_vm7 = vcmp.ge.s32.totalorder %v74_v30, %v3007_v28  ;;  %v3014_v32 = vsel %vm87_vm11, 0.0, %v2781_v22 }
  0xb4   :  { %vm80_vm10 = vmand %vm72_vm6, %vm77_vm7 }
  0xb5   :  { %2214 = vmatmul.mubr.msk.bf16.vlgmr.msra.gmra.mrb[0].mxu0 %vm96_vm0, %v119_v35  ;;  %vm88_vm12 = vmand %vm80_vm10, %vm86_vm9 }
  0xb6   :  { %2381 = vmatprep.mubr.msk.bf16.mxu0 %vm2774_vm1, %v2773_v48  ;;  %v3016_v33 = vsel %vm88_vm12, 0.0, %v2781_v22 }
 0x188   :  { %v181_v36 = vpop.f32.mrb[0].mxu0 }
 0x189   :  { %v183_v37 = vpop.f32.mrb[1].mxu0  ;;  %v200_v44 = vmul.f32 %v2947_v43, %v181_v36  ;;  %v221_v51 = vmul.f32 %v2960_v49, %v181_v36  ;;  %v190_v58 = vmul.f32 %v181_v36, %v2911_v14 }
 0x18a   :  { %v223_v38 = vmul.f32 %v183_v37, %v2906_v13  ;;  %v185_v39 = vpop.f32.mrb[2].mxu0 }
 0x18b   :  { %v2943_v40 = vpack.c.bf16 %v185_v39, %v181_v36  ;;  %v187_v41 = vpop.f32.mrb[3].mxu0  ;;  %v201_v46 = vmul.f32 %v2952_v45, %v185_v39  ;;  %v222_v52 = vmul.f32 %v2956_v47, %v185_v39  ;;  %v191_v59 = vmul.f32 %v185_v39, %v2927_v16 }
 0x18c   :  { %227 = vrot.lane.b32.xlu1 %v223_v38, %s2772_s24  ;;  %v224_v42 = vmul.f32 %v187_v41, %v2920_v15 }
 0x190   :  { %229 = vrot.lane.b32.xlu1 %v224_v42, %s2772_s24 }
 0x194   :  { %204 = vrot.lane.b32.xlu1 %v200_v44, %s2772_s24 }
 0x198   :  { %206 = vrot.lane.b32.xlu1 %v201_v46, %s2772_s24 }
 0x1fe   :  { %v228_v50 = vpop.permute.xlu1 %227 }
 0x1ff   :  { %v233_v54 = vadd.f32 %v228_v50, %v221_v51 }
 0x202   :  { %v230_v53 = vpop.permute.xlu1 %229 }
 0x203   :  { %v234_v55 = vadd.f32 %v230_v53, %v222_v52 }
 0x205   :  { %v235_v56 = vpack.c.bf16 %v234_v55, %v233_v54 }
 0x206   :  { %v205_v57 = vpop.permute.xlu1 %204 }
 0x207   :  { %291 = vrot.lane.b32.xlu0 %v235_v56, %s2775_s3  ;;  %238 = vrot.lane.b32.xlu1 %v235_v56, %s2771_s23  ;;  %v210_v61 = vadd.f32 %v205_v57, %v190_v58 }
 0x20a   :  { %v207_v60 = vpop.permute.xlu1 %206 }
 0x20b   :  { %v211_v62 = vadd.f32 %v207_v60, %v191_v59  ;;  %342 = vrot.lane.b32.xlu1 %v235_v56, %s2776_s30 }
 0x20d   :  { %v212_v63 = vpack.c.bf16 %v211_v62, %v210_v61 }
 0x20f   :  { %289 = vrot.lane.b32.xlu0 %v212_v63, %s2777_s0  ;;  %393 = vrot.lane.b32.xlu1 %v235_v56, %s2778_s17 }
 0x213   :  { %340 = vrot.lane.b32.xlu0 %v212_v63, %s2779_s18  ;;  %391 = vrot.lane.b32.xlu1 %v212_v63, %s2780_s19 }
 0x279   :  { %v292_v2 = vpop.permute.xlu0 %291  ;;  %v239_v3 = vpop.permute.xlu1 %238 }
 0x27a   :  { %v297_v4 = vsel %vm240_vm2, %v292_v2, 0  ;;  %v245_v5 = vsel %vm240_vm2, %v239_v3, 0 }
 0x27b   :  { %2374 = vmatpush3.bf16.xpose.msra.mxu1 %v245_v5  ;;  %2380 = vmatpush3.bf16.xpose.msra.mxu0 %v297_v4 }
 0x27c   :  { %2385 = vmatprep.subr.bf16.mxu1 %v2773_v48  ;;  %2391 = vmatprep.subr.bf16.mxu0 %v2773_v48 }
 0x27d   :  { %v343_v6 = vpop.permute.xlu1 %342 }
 0x27e   :  { %v348_v9 = vsel %vm240_vm2, %v343_v6, 0 }
 0x281   :  { %v290_v7 = vpop.permute.xlu0 %289  ;;  %v394_v8 = vpop.permute.xlu1 %393 }
 0x282   :  { %v399_v10 = vsel %vm240_vm2, %v394_v8, 0  ;;  %2376 = vmatmul.mubr.msk.bf16.vlgmr.msra.gmra.mrb[0].mxu1 %vm240_vm2, %v212_v63  ;;  %2382 = vmatmul.mubr.msk.bf16.vlgmr.msra.gmra.mrb[4].mxu0 %vm240_vm2, %v290_v7 }
 0x283   :  { %2386 = vmatpush3.bf16.xpose.msra.mxu1 %v348_v9  ;;  %2392 = vmatpush3.bf16.xpose.msra.mxu0 %v399_v10 }
 0x284   :  { %2387 = vmatprep.mubr.msk.bf16.mxu1 %vm2774_vm1, %v2773_v48  ;;  %2393 = vmatprep.mubr.msk.bf16.mxu0 %vm2774_vm1, %v2773_v48 }
 0x285   :  { %2397 = vmatprep.subr.bf16.mxu1 %v2773_v48  ;;  %2403 = vmatprep.subr.bf16.mxu0 %v2773_v48  ;;  %v341_v12 = vpop.permute.xlu0 %340  ;;  %v392_v17 = vpop.permute.xlu1 %391 }
 0x28a   :  { %2388 = vmatmul.mubr.msk.bf16.vlgmr.msra.gmra.mrb[4].mxu1 %vm240_vm2, %v341_v12  ;;  %2394 = vmatmul.mubr.msk.bf16.vlgmr.msra.gmra.mrb[8].mxu0 %vm240_vm2, %v392_v17 }
 0x28b   :  { %2399 = vmatprep.mubr.msk.bf16.mxu1 %vm2774_vm1, %v2773_v48  ;;  %2405 = vmatprep.mubr.msk.bf16.mxu0 %vm2774_vm1, %v2773_v48 }
 0x355   :  { %v281_v34 = vpop.f32.mrb[0].mxu1  ;;  %v333_v35 = vpop.f32.mrb[4].mxu0 }
 0x356   :  { %v282_v36 = vadd.f32 %v281_v34, %v3014_v32  ;;  %v2377_v37 = vpop.f32.mrb[1].mxu1  ;;  %v2383_v38 = vpop.f32.mrb[5].mxu0  ;;  %v334_v42 = vadd.f32 %v333_v35, %v3014_v32 }
 0x357   :  { %v284_v39 = vpop.f32.mrb[2].mxu1  ;;  %v336_v41 = vpop.f32.mrb[6].mxu0 }
 0x358   :  { %v285_v44 = vadd.f32 %v284_v39, %v3016_v33  ;;  %v2378_v46 = vpop.f32.mrb[3].mxu1  ;;  %v2384_v50 = vpop.f32.mrb[7].mxu0  ;;  %v443_v51 = vsel %vm442_vm13, %v282_v36, -inf  ;;  %v337_v53 = vadd.f32 %v336_v41, %v3016_v33  ;;  %v449_v54 = vsel %vm442_vm13, %v334_v42, -inf }
 0x359   :  { %444 = vmax.xlane.f32.xlu0 %v443_v51 }
 0x35a   :  { %v446_v52 = vsel %vm442_vm13, %v285_v44, -inf  ;;  %v452_v4 = vsel %vm442_vm13, %v337_v53, -inf }
 0x35b   :  { %447 = vmax.xlane.f32.xlu1 %v446_v52 }
 0x35d   :  { %450 = vmax.xlane.f32.xlu0 %v449_v54  ;;  %v384_v55 = vpop.f32.mrb[4].mxu1  ;;  %v435_v56 = vpop.f32.mrb[8].mxu0 }
 0x35e   :  { %v385_v57 = vadd.f32 %v384_v55, %v3014_v32  ;;  %v2389_v58 = vpop.f32.mrb[5].mxu1  ;;  %v2395_v59 = vpop.f32.mrb[9].mxu0  ;;  %v436_v62 = vadd.f32 %v435_v56, %v3014_v32 }
 0x35f   :  { %v387_v60 = vpop.f32.mrb[6].mxu1  ;;  %v438_v61 = vpop.f32.mrb[10].mxu0 }
 0x360   :  { %v388_v63 = vadd.f32 %v387_v60, %v3016_v33  ;;  %v2390_v2 = vpop.f32.mrb[7].mxu1  ;;  %v2396_v3 = vpop.f32.mrb[11].mxu0  ;;  %v455_v5 = vsel %vm442_vm13, %v385_v57, -inf  ;;  %v439_v6 = vadd.f32 %v438_v61, %v3016_v33  ;;  %v461_v8 = vsel %vm442_vm13, %v436_v62, -inf }
 0x361   :  { %453 = vmax.xlane.f32.xlu0 %v452_v4  ;;  %456 = vmax.xlane.f32.xlu1 %v455_v5 }
 0x362   :  { %v458_v7 = vsel %vm442_vm13, %v388_v63, -inf  ;;  %v464_v9 = vsel %vm442_vm13, %v439_v6, -inf }
 0x365   :  { %459 = vmax.xlane.f32.xlu0 %v458_v7  ;;  %462 = vmax.xlane.f32.xlu1 %v461_v8 }
 0x369   :  { %465 = vmax.xlane.f32.xlu0 %v464_v9 }
 0x376   :  { %536 = vrot.lane.b32.xlu1 %v2943_v40, %s2782_s2 }
 0x3e6   :  { %v445_v10 = vpop.xlane.xlu0 %444 }
 0x3e7   :  { %v467_v12 = vsub.f32 %v282_v36, %v445_v10 }
 0x3e8   :  { %v448_v17 = vpop.xlane.xlu1 %447 }
 0x3e9   :  { %v475_v18 = vmul.f32 1.442695, %v467_v12  ;;  %v468_v19 = vsub.f32 %v285_v44, %v448_v17 }
 0x3ea   :  { %v451_v20 = vpop.xlane.xlu0 %450 }
 0x3eb   :  { %2648 = vpow2.f32 %v475_v18  ;;  %v477_v21 = vmul.f32 1.442695, %v468_v19  ;;  %v469_v23 = vsub.f32 %v334_v42, %v451_v20 }
 0x3ed   :  { %2650 = vpow2.f32 %v477_v21  ;;  %v479_v27 = vmul.f32 1.442695, %v469_v23 }
 0x3ee   :  { %v454_v29 = vpop.xlane.xlu0 %453  ;;  %v457_v30 = vpop.xlane.xlu1 %456 }
 0x3ef   :  { %2652 = vpow2.f32 %v479_v27  ;;  %v470_v31 = vsub.f32 %v337_v53, %v454_v29  ;;  %v471_v22 = vsub.f32 %v385_v57, %v457_v30 }
 0x3f1   :  { %v481_v34 = vmul.f32 1.442695, %v470_v31  ;;  %v483_v35 = vmul.f32 1.442695, %v471_v22 }
 0x3f2   :  { %v460_v37 = vpop.xlane.xlu0 %459  ;;  %v463_v38 = vpop.xlane.xlu1 %462 }
 0x3f3   :  { %2654 = vpow2.f32 %v481_v34  ;;  %v472_v36 = vsub.f32 %v388_v63, %v460_v37  ;;  %v473_v39 = vsub.f32 %v436_v62, %v463_v38 }
 0x3f4   :  { %2656 = vpow2.f32 %v483_v35 }
 0x3f5   :  { %v2649_v41 = vpop.eup %2648  ;;  %v485_v44 = vmul.f32 1.442695, %v472_v36  ;;  %v487_v46 = vmul.f32 1.442695, %v473_v39 }
 0x3f6   :  { %v466_v50 = vpop.xlane.xlu0 %465  ;;  %v537_v42 = vpop.permute.xlu1 %536  ;;  %v491_v51 = vsel %vm442_vm13, %v2649_v41, 0.0 }
 0x3f7   :  { %v2651_v52 = vpop.eup %2650  ;;  %2658 = vpow2.f32 %v485_v44  ;;  %v474_v54 = vsub.f32 %v439_v6, %v466_v50  ;;  %492 = vadd.xlane.f32.xlu1 %v491_v51  ;;  %2398 = vmatpush3.bf16.msra.mxu1 %v537_v42 }
 0x3f8   :  { %2660 = vpow2.f32 %v487_v46  ;;  %v494_v53 = vsel %vm442_vm13, %v2651_v52, 0.0  ;;  %2409 = vmatprep.subr.bf16.mxu1 %v2773_v48 }
 0x3f9   :  { %v2653_v55 = vpop.eup %2652  ;;  %v489_v56 = vmul.f32 1.442695, %v474_v54  ;;  %495 = vadd.xlane.f32.xlu0 %v494_v53 }
 0x3fa   :  { %v497_v57 = vsel %vm442_vm13, %v2653_v55, 0.0 }
 0x3fb   :  { %2662 = vpow2.f32 %v489_v56  ;;  %498 = vadd.xlane.f32.xlu1 %v497_v57  ;;  %v2622_v57 = vld [vmem:[%s3383_s7] sm:$0xff]  }
 0x3fd   :  { %v2655_v58 = vpop.eup %2654 }
 0x3fe   :  { %v2657_v59 = vpop.eup %2656  ;;  %v500_v60 = vsel %vm442_vm13, %v2655_v58, 0.0 }
 0x3ff   :  { %501 = vadd.xlane.f32.xlu0 %v500_v60  ;;  %v503_v61 = vsel %vm442_vm13, %v2657_v59, 0.0  ;;  %v2623_v60 = vld [vmem:[%s3383_s7 + $0x8] sm:$0xff]  }
 0x400   :  { %504 = vadd.xlane.f32.xlu1 %v503_v61 }
 0x401   :  { %v2659_v62 = vpop.eup %2658 }
 0x402   :  { %v2661_v63 = vpop.eup %2660  ;;  %v506_v2 = vsel %vm442_vm13, %v2659_v62, 0.0 }
 0x403   :  { %507 = vadd.xlane.f32.xlu0 %v506_v2  ;;  %v509_v3 = vsel %vm442_vm13, %v2661_v63, 0.0 }
 0x404   :  { %510 = vadd.xlane.f32.xlu1 %v509_v3 }
 0x405   :  { %v2663_v4 = vpop.eup %2662 }
 0x406   :  { %v512_v5 = vsel %vm442_vm13, %v2663_v4, 0.0 }
 0x407   :  { %513 = vadd.xlane.f32.xlu0 %v512_v5 }
 0x415   :  { %630 = vrot.lane.b32.xlu1 %v2943_v40, %s2783_s22 }
 0x419   :  { %677 = vrot.lane.b32.xlu1 %v2943_v40, %s3398_s25 }
 0x41d   :  { %583 = vrot.lane.b32.xlu0 %v2943_v40, %s3397_s26 }
 0x484   :  { %v493_v6 = vpop.xlane.xlu1 %492 }
 0x485   :  { %2664 = vrcp.f32 %v493_v6 }
 0x486   :  { %v496_v7 = vpop.xlane.xlu0 %495 }
 0x487   :  { %2666 = vrcp.f32 %v496_v7 }
 0x488   :  { %v499_v8 = vpop.xlane.xlu1 %498 }
 0x489   :  { %2668 = vrcp.f32 %v499_v8 }
 0x48c   :  { %v502_v9 = vpop.xlane.xlu0 %501 }
 0x48d   :  { %2670 = vrcp.f32 %v502_v9  ;;  %v505_v10 = vpop.xlane.xlu1 %504 }
 0x48e   :  { %2672 = vrcp.f32 %v505_v10 }
 0x48f   :  { %v2665_v12 = vpop.eup %2664 }
 0x490   :  { %v508_v17 = vpop.xlane.xlu0 %507  ;;  %v523_v20 = vmul.f32 %v2665_v12, %v2649_v41 }
 0x491   :  { %v2667_v18 = vpop.eup %2666  ;;  %2674 = vrcp.f32 %v508_v17  ;;  %v511_v19 = vpop.xlane.xlu1 %510 }
 0x492   :  { %v524_v21 = vmul.f32 %v2667_v18, %v2651_v52  ;;  %2676 = vrcp.f32 %v511_v19 }
 0x493   :  { %v2669_v27 = vpop.eup %2668 }
 0x494   :  { %v514_v23 = vpop.xlane.xlu0 %513  ;;  %v531_v40 = vpack.c.bf16 %v524_v21, %v523_v20  ;;  %v525_v31 = vmul.f32 %v2669_v27, %v2653_v55 }
 0x495   :  { %2678 = vrcp.f32 %v514_v23  ;;  %v631_v29 = vpop.permute.xlu1 %630 }
 0x496   :  { %2400 = vmatmul.mubr.msk.bf16.vlgmr.msra.gmra.mrb[8].mxu1 %vm442_vm13, %v531_v40 }
 0x497   :  { %v2671_v30 = vpop.eup %2670  ;;  %2410 = vmatpush3.bf16.msra.mxu1 %v631_v29  ;;  %2411 = vmatprep.mubr.msk.bf16.mxu1 %vm2774_vm1, %v2773_v48 }
 0x498   :  { %v526_v22 = vmul.f32 %v2671_v30, %v2655_v58  ;;  %v584_v34 = vpop.permute.xlu0 %583  ;;  %2421 = vmatprep.subr.bf16.mxu1 %v2773_v48  ;;  %v2673_v35 = vpop.eup %2672 }
 0x499   :  { %2404 = vmatpush3.bf16.msra.mxu0 %v584_v34  ;;  %v527_v36 = vmul.f32 %v2673_v35, %v2657_v59  ;;  %v678_v41 = vpop.permute.xlu1 %677 }
 0x49a   :  { %v532_v37 = vpack.c.bf16 %v526_v22, %v525_v31  ;;  %2415 = vmatprep.subr.bf16.mxu0 %v2773_v48 }
 0x49b   :  { %v2675_v38 = vpop.eup %2674 }
 0x49c   :  { %v528_v39 = vmul.f32 %v2675_v38, %v2659_v62  ;;  %2406 = vmatmul.mubr.msk.bf16.vlgmr.msra.gmra.mrb[12].mxu0 %vm442_vm13, %v532_v37  ;;  %v2677_v44 = vpop.eup %2676 }
 0x49d   :  { %2416 = vmatpush3.bf16.msra.mxu0 %v678_v41  ;;  %2417 = vmatprep.mubr.msk.bf16.mxu0 %vm2774_vm1, %v2773_v48  ;;  %v529_v42 = vmul.f32 %v2677_v44, %v2661_v63 }
 0x49e   :  { %v533_v46 = vpack.c.bf16 %v528_v39, %v527_v36  ;;  %2429 = vmatprep.subr.bf16.mxu0 %v2773_v48 }
 0x49f   :  { %v2679_v50 = vpop.eup %2678 }
 0x4a0   :  { %v530_v51 = vmul.f32 %v2679_v50, %v2663_v4  ;;  %2412 = vmatmul.mubr.msk.bf16.vlgmr.msra.gmra.mrb[12].mxu1 %vm442_vm13, %v533_v46 }
 0x4a1   :  { %2425 = vmatprep.mubr.msk.bf16.mxu1 %vm2774_vm1, %v2773_v48  ;;  %2422 = vmatpush3.bf16.msra.mxu1 %v2622_v57 }
 0x4a2   :  { %v534_v52 = vpack.c.bf16 %v530_v51, %v529_v42  ;;  %2423 = vmatprep.subr.bf16.mxu1 %v2773_v48 }
 0x4a4   :  { %2418 = vmatmul.mubr.msk.bf16.vlgmr.msra.gmra.mrb[16].mxu0 %vm442_vm13, %v534_v52 }
 0x4a5   :  { %2433 = vmatprep.mubr.msk.bf16.mxu0 %vm2774_vm1, %v2773_v48  ;;  %2424 = vmatpush3.bf16.msra.mxu1 %v2623_v60 }
 0x4a6   :  { %2437 = vmatprep.subr.bf16.mxu1 %v2773_v48 }
 0x569   :  { %v576_v54 = vpop.f32.mrb[8].mxu1 }
 0x56a   :  { %v2401_v53 = vpop.f32.mrb[9].mxu1 }
 0x56b   :  { %v579_v55 = vpop.f32.mrb[10].mxu1 }
 0x56c   :  { %v2402_v56 = vpop.f32.mrb[11].mxu1 }
 0x56f   :  { %v623_v58 = vpop.f32.mrb[12].mxu0 }
 0x570   :  { %v2407_v59 = vpop.f32.mrb[13].mxu0 }
 0x571   :  { %v626_v61 = vpop.f32.mrb[14].mxu0 }
 0x572   :  { %v2586_v62 = vpack.i.bf16 %v626_v61, %v623_v58  ;;  %v2408_v63 = vpop.f32.mrb[15].mxu0 }
 0x573   :  { %v670_v2 = vpop.f32.mrb[12].mxu1 }
 0x574   :  { %2587 = vrot.lane.b32.xlu0 %v2586_v62, %s3396_s20  ;;  %v2413_v3 = vpop.f32.mrb[13].mxu1 }
 0x575   :  { %v673_v4 = vpop.f32.mrb[14].mxu1 }
 0x576   :  { %v2591_v5 = vpack.i.bf16 %v673_v4, %v670_v2  ;;  %v2414_v6 = vpop.f32.mrb[15].mxu1  ;;  %v826_v2 = vld [vmem:[%s3384_s8] sm:$0x1] }
 0x577   :  { %v717_v7 = vpop.f32.mrb[16].mxu0  ;;  %v845_v3 = vunpack.c.l.bf16 %v826_v2  ;;  %v2633_v2 = vld [vmem:[%s3382_s6 + $0x30] ss:$8 sps:$4 sm:$0xff]  }
 0x578   :  { %2592 = vrot.lane.b32.xlu1 %v2591_v5, %s3395_s21  ;;  %v2419_v8 = vpop.f32.mrb[17].mxu0 }
 0x579   :  { %v720_v9 = vpop.f32.mrb[18].mxu0  ;;  %v849_v6 = vrot.slane %v845_v3, %v2938_v26  ;;  %v2635_v3 = vld [vmem:[%s3382_s6 + $0x34] ss:$8 sps:$4 sm:$0xff]  }
 0x57a   :  { %v2596_v10 = vpack.i.bf16 %v720_v9, %v717_v7  ;;  %v2420_v12 = vpop.f32.mrb[19].mxu0 }
 0x57c   :  { %2597 = vrot.lane.b32.xlu0 %v2596_v10, %s3394_s27 }
 0x5e6   :  { %v2588_v17 = vpop.permute.xlu0 %2587 }
 0x5e7   :  { %v2590_v19 = vunpack.i.h.bf16 %v2588_v17  ;;  %v2589_v20 = vunpack.i.l.bf16 %v2588_v17  ;;  %v2626_v17 = vld [vmem:[%s3386_s10] sm:$0xff]  }
 0x5e9   :  { %v749_v27 = vsel %vm240_vm2, %v579_v55, %v2590_v19  ;;  %v748_v29 = vsel %vm240_vm2, %v576_v54, %v2589_v20  ;;  %v2628_v19 = vld [vmem:[%s3386_s10 + $0x10] sm:$0xff]  }
 0x5ea   :  { %v2593_v18 = vpop.permute.xlu1 %2592 }
 0x5eb   :  { %v2595_v21 = vunpack.i.h.bf16 %v2593_v18  ;;  %v2594_v23 = vunpack.i.l.bf16 %v2593_v18  ;;  %v2627_v18 = vld [vmem:[%s3386_s10 + $0x8] sm:$0xff]  }
 0x5ed   :  { %v751_v22 = vsel %vm442_vm13, %v749_v27, %v2595_v21  ;;  %v750_v34 = vsel %vm442_vm13, %v748_v29, %v2594_v23 }
 0x5ee   :  { %v2598_v40 = vpop.permute.xlu0 %2597 }
 0x5ef   :  { %v2600_v30 = vunpack.i.h.bf16 %v2598_v40  ;;  %v2599_v31 = vunpack.i.l.bf16 %v2598_v40 }
 0x5f1   :  { %v753_v35 = vsel %vm752_vm14, %v750_v34, %v2599_v31  ;;  %v754_v37 = vsel %vm752_vm14, %v751_v22, %v2600_v30 }
 0x5f2   :  { %v755_v38 = vpack.c.bf16 %v754_v37, %v753_v35 }
 0x5f4   :  { %2426 = vmatmul.mubr.msk.bf16.vlgmr.msra.gmra.mrb[16].mxu1 %vm96_vm0, %v755_v38 }
 0x5f5   :  { %2445 = vmatprep.mubr.msk.bf16.mxu1 %vm2774_vm1, %v2773_v48  ;;  %2438 = vmatpush3.bf16.msra.mxu1 %v2626_v17 }
 0x5f6   :  { %2439 = vmatprep.subr.bf16.mxu1 %v2773_v48 }
 0x5f9   :  { %2440 = vmatpush3.bf16.msra.mxu1 %v2627_v18 }
 0x5fa   :  { %2441 = vmatprep.subr.bf16.mxu1 %v2773_v48 }
 0x5fd   :  { %2442 = vmatpush3.bf16.msra.mxu1 %v2628_v19 }
 0x5fe   :  { %2443 = vmatprep.subr.bf16.mxu1 %v2773_v48 }
 0x6c7   :  { %v809_v36 = vpop.f32.mrb[16].mxu1 }
 0x6c8   :  { %v2299_v39 = vpack.c.bf16 %v809_v36, %v809_v36  ;;  %v2427_v41 = vpop.f32.mrb[17].mxu1 }
 0x6c9   :  { %v812_v44 = vpop.f32.mrb[18].mxu1 }
 0x6ca   :  { %v3087_v46 = vadd.bf16 %v2299_v39, %v2879_v0  ;;  %v2300_v50 = vpack.c.bf16 %v812_v44, %v812_v44  ;;  %v2428_v42 = vpop.f32.mrb[19].mxu1  ;;  %v2624_v0 = vld [vmem:[%s3385_s9] sm:$0xff]  }
 0x6cb   :  { %2430 = vmatpush3.bf16.msra.mxu0 %v2624_v0 }
 0x6cc   :  { %v3090_v51 = vadd.bf16 %v2300_v50, %v2884_v1  ;;  %v827_v52 = vunpack.c.l.bf16 %v3087_v46  ;;  %v2625_v1 = vld [vmem:[%s3385_s9 + $0x8] sm:$0xff]   ;;  %2431 = vmatprep.subr.bf16.mxu0 %v2773_v48 }
 0x6ce   :  { %v829_v54 = vmul.f32 %v827_v52, %v827_v52  ;;  %v828_v53 = vunpack.c.l.bf16 %v3090_v51 }
 0x6cf   :  { %2432 = vmatpush3.bf16.msra.mxu0 %v2625_v1 }
 0x6d0   :  { %v831_v55 = vsel %vm96_vm0, %v829_v54, 0.0  ;;  %v830_v56 = vmul.f32 %v828_v53, %v828_v53 }
 0x6d1   :  { %832 = vadd.xlane.f32.xlu1 %v831_v55 }
 0x6d2   :  { %v834_v57 = vsel %vm96_vm0, %v830_v56, 0.0 }
 0x6d3   :  { %835 = vadd.xlane.f32.xlu0 %v834_v57 }
 0x75e   :  { %v833_v58 = vpop.xlane.xlu1 %832 }
 0x75f   :  { %v837_v59 = vmul.f32 0.03125, %v833_v58 }
 0x760   :  { %v836_v60 = vpop.xlane.xlu0 %835 }
 0x761   :  { %v839_v61 = vadd.f32 1e-06, %v837_v59  ;;  %v838_v62 = vmul.f32 0.03125, %v836_v60 }
 0x763   :  { %2680 = vrsqrt.f32 %v839_v61  ;;  %v840_v63 = vadd.f32 1e-06, %v838_v62 }
 0x765   :  { %2682 = vrsqrt.f32 %v840_v63 }
 0x76d   :  { %v2681_v4 = vpop.eup %2680 }
 0x76e   :  { %v843_v5 = vmul.f32 %v2681_v4, %v827_v52 }
 0x76f   :  { %v2683_v7 = vpop.eup %2682 }
 0x770   :  { %v844_v8 = vmul.f32 %v2683_v7, %v828_v53  ;;  %v850_v9 = vmul.f32 %v849_v6, %v843_v5 }
 0x772   :  { %v851_v10 = vmul.f32 %v849_v6, %v844_v8 }
 0x774   :  { %v852_v12 = vpack.c.bf16 %v851_v10, %v850_v9  ;;  %v2240_v10 = vld [vmem:[%s3381_s5 + $0x1] sm:$0x1]  ;;  %s3401_s5 = smov 40  }
 0x776   :  { %2434 = vmatmul.mubr.msk.bf16.vlgmr.msra.gmra.mrb[20].mxu0 %vm96_vm0, %v852_v12  ;;  %v1045_v12 = vunpack.c.l.bf16 %v2240_v10 }
 0x777   :  { %1113 = vmatprep.mubr.bf16.mxu0 %v2770_v11  ;;  %v2629_v11 = vld [vmem:[%s3386_s10 + $0x18] sm:$0xff]  }
 0x778   :  { %2444 = vmatpush3.bf16.msra.mxu1 %v2629_v11  ;;  %v1049_v19 = vrot.slane %v1045_v12, %v2938_v26 }
 0x779   :  { %2455 = vmatprep.subr.bf16.mxu1 %v2773_v48 }
 0x849   :  { %v906_v20 = vpop.f32.mrb[20].mxu0 }
 0x84a   :  { %929 = vrot.lane.b32.xlu0 %v906_v20, %s2782_s2  ;;  %v2435_v21 = vpop.f32.mrb[21].mxu0  ;;  %v2231_v27 = vmul.f32 -1.442695, %v906_v20 }
 0x84b   :  { %v909_v23 = vpop.f32.mrb[22].mxu0 }
 0x84c   :  { %931 = vrot.lane.b32.xlu1 %v909_v23, %s2782_s2  ;;  %v2436_v40 = vpop.f32.mrb[23].mxu0  ;;  %v2232_v29 = vmul.f32 -1.442695, %v909_v23  ;;  %2684 = vpow2.f32 %v2231_v27 }
 0x84e   :  { %2686 = vpow2.f32 %v2232_v29 }
 0x856   :  { %v2685_v30 = vpop.eup %2684 }
 0x857   :  { %v919_v22 = vadd.f32 1.0, %v2685_v30 }
 0x858   :  { %v2687_v31 = vpop.eup %2686 }
 0x859   :  { %v920_v34 = vadd.f32 1.0, %v2687_v31  ;;  %2688 = vrcp.f32 %v919_v22 }
 0x85b   :  { %2690 = vrcp.f32 %v920_v34 }
 0x863   :  { %v2689_v35 = vpop.eup %2688 }
 0x864   :  { %v925_v36 = vmul.f32 %v2689_v35, %v906_v20 }
 0x865   :  { %v2691_v37 = vpop.eup %2690 }
 0x866   :  { %v926_v39 = vmul.f32 %v2691_v37, %v909_v23 }
 0x8bc   :  { %v930_v38 = vpop.permute.xlu0 %929 }
 0x8bd   :  { %v935_v44 = vmul.f32 %v930_v38, %v925_v36 }
 0x8be   :  { %v932_v41 = vpop.permute.xlu1 %931 }
 0x8bf   :  { %v936_v50 = vmul.f32 %v932_v41, %v926_v39 }
 0x8c1   :  { %v937_v42 = vpack.c.bf16 %v936_v50, %v935_v44 }
 0x8c3   :  { %2446 = vmatmul.mubr.msk.bf16.vlgmr.msra.gmra.mrb[20].mxu1 %vm970_vm15, %v937_v42 }
 0x8c4   :  { %2457 = vmatprep.mubr.msk.bf16.mxu1 %vm2774_vm1, %v2773_v48 }
 0x996   :  { %v1008_v52 = vpop.f32.mrb[20].mxu1 }
 0x997   :  { %v2301_v54 = vpack.c.bf16 %v1008_v52, %v1008_v52  ;;  %v2447_v53 = vpop.f32.mrb[21].mxu1 }
 0x998   :  { %v1011_v55 = vpop.f32.mrb[22].mxu1 }
 0x999   :  { %v3131_v56 = vadd.bf16 %v2301_v54, %v3087_v46  ;;  %v2302_v57 = vpack.c.bf16 %v1011_v55, %v1011_v55  ;;  %v2448_v0 = vpop.f32.mrb[23].mxu1  ;;  %v2632_v46 = vld [vmem:[%s3382_s6 + $0x24] ss:$8 sps:$4 sm:$0xff]  }
 0x99a   :  { %1081 = vmatprep.subr.bf16.mxu0 %v2632_v46 }
 0x99b   :  { %v3134_v1 = vadd.bf16 %v2302_v57, %v3090_v51  ;;  %v1027_v58 = vunpack.c.l.bf16 %v3131_v56  ;;  %v2630_v51 = vld [vmem:[%s3382_s6 + $0x20] ss:$8 sps:$4 sm:$0xff]   ;;  %s3402_s6 = smov 56  }
 0x99c   :  { %1082 = vmatpush1.bf16.msra.mxu0 %v2630_v51 }
 0x99d   :  { %v1029_v59 = vmul.f32 %v1027_v58, %v1027_v58  ;;  %v1028_v60 = vunpack.c.l.bf16 %v3134_v1  ;;  %1083 = vmatprep.subr.bf16.mxu0 %v2635_v3 }
 0x99f   :  { %v1031_v61 = vsel %vm96_vm0, %v1029_v59, 0.0  ;;  %v1030_v62 = vmul.f32 %v1028_v60, %v1028_v60 }
 0x9a0   :  { %1032 = vadd.xlane.f32.xlu1 %v1031_v61  ;;  %1084 = vmatpush1.bf16.msra.mxu0 %v2633_v2 }
 0x9a1   :  { %v1034_v63 = vsel %vm96_vm0, %v1030_v62, 0.0  ;;  %2449 = vmatprep.subr.bf16.mxu0 %v2773_v48 }
 0x9a2   :  { %1035 = vadd.xlane.f32.xlu0 %v1034_v63 }
 0xa2d   :  { %v1033_v4 = vpop.xlane.xlu1 %1032 }
 0xa2e   :  { %v1037_v5 = vmul.f32 0.03125, %v1033_v4 }
 0xa2f   :  { %v1036_v6 = vpop.xlane.xlu0 %1035 }
 0xa30   :  { %v1039_v7 = vadd.f32 1e-06, %v1037_v5  ;;  %v1038_v8 = vmul.f32 0.03125, %v1036_v6 }
 0xa32   :  { %2692 = vrsqrt.f32 %v1039_v7  ;;  %v1040_v9 = vadd.f32 1e-06, %v1038_v8 }
 0xa34   :  { %2694 = vrsqrt.f32 %v1040_v9 }
 0xa3c   :  { %v2693_v17 = vpop.eup %2692 }
 0xa3d   :  { %v1043_v18 = vmul.f32 %v2693_v17, %v1027_v58 }
 0xa3e   :  { %v2695_v11 = vpop.eup %2694 }
 0xa3f   :  { %v1044_v20 = vmul.f32 %v2695_v11, %v1028_v60  ;;  %v1050_v21 = vmul.f32 %v1049_v19, %v1043_v18 }
 0xa41   :  { %v1051_v23 = vmul.f32 %v1049_v19, %v1044_v20 }
 0xa43   :  { %v1052_v40 = vpack.c.bf16 %v1051_v23, %v1050_v21 }
 0xa45   :  { %2249 = vmatmul.mubr.msk.bf16.vlgmr.msra.gmra.mrb[24].mxu0 %vm96_vm0, %v1052_v40 }
 0xa46   :  { %2451 = vmatprep.mubr.msk.bf16.mxu0 %vm2774_vm1, %v2773_v48 }
 0xb18   :  { %v1115_v27 = vpop.f32.mrb[24].mxu0 }
 0xb19   :  { %v1117_v29 = vpop.f32.mrb[25].mxu0  ;;  %v1126_v38 = vmul.f32 %v1115_v27, %v2947_v43 }
 0xb1a   :  { %v1141_v30 = vmul.f32 %v1117_v29, %v2906_v13  ;;  %v1119_v31 = vpop.f32.mrb[26].mxu0  ;;  %v1139_v13 = vmul.f32 %v1115_v27, %v2960_v49 }
 0xb1b   :  { %v3161_v22 = vpack.c.bf16 %v1119_v31, %v1115_v27  ;;  %v1121_v34 = vpop.f32.mrb[27].mxu0  ;;  %v1127_v37 = vmul.f32 %v1119_v31, %v2952_v45  ;;  %v1140_v39 = vmul.f32 %v1119_v31, %v2956_v47  ;;  %v1125_v52 = vmul.f32 %v1119_v31, %v2927_v16 }
 0xb1c   :  { %v1142_v35 = vmul.f32 %v1121_v34, %v2920_v15  ;;  %1145 = vrot.lane.b32.xlu0 %v1141_v30, %s2772_s24  ;;  %v1124_v45 = vmul.f32 %v1115_v27, %v2911_v14 }
 0xb1e   :  { %1147 = vrot.lane.b32.xlu1 %v1142_v35, %s2772_s24 }
 0xb20   :  { %1132 = vrot.lane.b32.xlu0 %v1127_v37, %s2772_s24 }
 0xb22   :  { %1130 = vrot.lane.b32.xlu1 %v1126_v38, %s2772_s24 }
 0xb8e   :  { %v1146_v36 = vpop.permute.xlu0 %1145 }
 0xb8f   :  { %v1151_v44 = vadd.f32 %v1146_v36, %v1139_v13 }
 0xb90   :  { %v1148_v41 = vpop.permute.xlu1 %1147 }
 0xb91   :  { %v1152_v15 = vadd.f32 %v1148_v41, %v1140_v39 }
 0xb92   :  { %v1133_v50 = vpop.permute.xlu0 %1132 }
 0xb93   :  { %v1153_v42 = vpack.c.bf16 %v1152_v15, %v1151_v44  ;;  %v1137_v53 = vadd.f32 %v1133_v50, %v1125_v52 }
 0xb94   :  { %v1131_v54 = vpop.permute.xlu1 %1130 }
 0xb95   :  { %v1136_v55 = vadd.f32 %v1131_v54, %v1124_v45  ;;  %1208 = vrot.lane.b32.xlu0 %v1153_v42, %s2775_s3  ;;  %1156 = vrot.lane.b32.xlu1 %v1153_v42, %s2771_s23 }
 0xb97   :  { %v1138_v43 = vpack.c.bf16 %v1137_v53, %v1136_v55 }
 0xb99   :  { %1259 = vrot.lane.b32.xlu1 %v1153_v42, %s2776_s30  ;;  %1206 = vrot.lane.b32.xlu0 %v1138_v43, %s2777_s0  ;;  %s3403_s0 = smov 8  }
 0xb9d   :  { %1310 = vrot.lane.b32.xlu1 %v1153_v42, %s2778_s17  ;;  %1257 = vrot.lane.b32.xlu0 %v1138_v43, %s2779_s18  ;;  %s3404_s17 = smov 16  }
 0xba1   :  { %1308 = vrot.lane.b32.xlu1 %v1138_v43, %s2780_s19 }
 0xc07   :  { %v1209_v16 = vpop.permute.xlu0 %1208  ;;  %v1157_v14 = vpop.permute.xlu1 %1156 }
 0xc08   :  { %v1214_v47 = vsel %vm240_vm2, %v1209_v16, 0  ;;  %v1162_v49 = vsel %vm240_vm2, %v1157_v14, 0 }
 0xc09   :  { %2450 = vmatpush3.bf16.xpose.msra.mxu0 %v1162_v49  ;;  %2456 = vmatpush3.bf16.xpose.msra.mxu1 %v1214_v47 }
 0xc0a   :  { %2461 = vmatprep.subr.bf16.mxu0 %v2773_v48  ;;  %2467 = vmatprep.subr.bf16.mxu1 %v2773_v48 }
 0xc0b   :  { %v1260_v57 = vpop.permute.xlu1 %1259  ;;  %v1207_v0 = vpop.permute.xlu0 %1206 }
 0xc0c   :  { %v1265_v59 = vsel %vm240_vm2, %v1260_v57, 0 }
 0xc0f   :  { %v1311_v58 = vpop.permute.xlu1 %1310  ;;  %v1258_v61 = vpop.permute.xlu0 %1257 }
 0xc10   :  { %v1316_v60 = vsel %vm240_vm2, %v1311_v58, 0  ;;  %2452 = vmatmul.mubr.msk.bf16.vlgmr.msra.gmra.mrb[28].mxu0 %vm240_vm2, %v1138_v43  ;;  %2458 = vmatmul.mubr.msk.bf16.vlgmr.msra.gmra.mrb[24].mxu1 %vm240_vm2, %v1207_v0 }
 0xc11   :  { %2462 = vmatpush3.bf16.xpose.msra.mxu0 %v1265_v59  ;;  %2468 = vmatpush3.bf16.xpose.msra.mxu1 %v1316_v60 }
 0xc12   :  { %2463 = vmatprep.mubr.msk.bf16.mxu0 %vm2774_vm1, %v2773_v48  ;;  %2469 = vmatprep.mubr.msk.bf16.mxu1 %vm2774_vm1, %v2773_v48 }
 0xc13   :  { %2473 = vmatprep.subr.bf16.mxu0 %v2773_v48  ;;  %2479 = vmatprep.subr.bf16.mxu1 %v2773_v48  ;;  %v1309_v62 = vpop.permute.xlu1 %1308 }
 0xc18   :  { %2464 = vmatmul.mubr.msk.bf16.vlgmr.msra.gmra.mrb[32].mxu0 %vm240_vm2, %v1258_v61  ;;  %2470 = vmatmul.mubr.msk.bf16.vlgmr.msra.gmra.mrb[28].mxu1 %vm240_vm2, %v1309_v62 }
 0xc19   :  { %2475 = vmatprep.mubr.msk.bf16.mxu0 %vm2774_vm1, %v2773_v48  ;;  %2481 = vmatprep.mubr.msk.bf16.mxu1 %vm2774_vm1, %v2773_v48 }
 0xce3   :  { %v1198_v63 = vpop.f32.mrb[28].mxu0  ;;  %v1250_v46 = vpop.f32.mrb[24].mxu1 }
 0xce4   :  { %v1199_v51 = vadd.f32 %v1198_v63, %v3014_v32  ;;  %v2453_v2 = vpop.f32.mrb[29].mxu0  ;;  %v2459_v3 = vpop.f32.mrb[25].mxu1  ;;  %v1251_v6 = vadd.f32 %v1250_v46, %v3014_v32 }
 0xce5   :  { %v1201_v4 = vpop.f32.mrb[30].mxu0  ;;  %v1253_v5 = vpop.f32.mrb[26].mxu1 }
 0xce6   :  { %v1202_v7 = vadd.f32 %v1201_v4, %v3016_v33  ;;  %v2454_v8 = vpop.f32.mrb[31].mxu0  ;;  %v2460_v9 = vpop.f32.mrb[27].mxu1  ;;  %v1359_v10 = vsel %vm442_vm13, %v1199_v51, -inf  ;;  %v1254_v17 = vadd.f32 %v1253_v5, %v3016_v33  ;;  %v1365_v18 = vsel %vm442_vm13, %v1251_v6, -inf }
 0xce7   :  { %1360 = vmax.xlane.f32.xlu0 %v1359_v10 }
 0xce8   :  { %v1362_v12 = vsel %vm442_vm13, %v1202_v7, -inf  ;;  %v1368_v37 = vsel %vm442_vm13, %v1254_v17, -inf }
 0xce9   :  { %1363 = vmax.xlane.f32.xlu1 %v1362_v12 }
 0xceb   :  { %v1301_v19 = vpop.f32.mrb[32].mxu0  ;;  %1366 = vmax.xlane.f32.xlu0 %v1365_v18  ;;  %v1352_v11 = vpop.f32.mrb[28].mxu1 }
 0xcec   :  { %v1302_v20 = vadd.f32 %v1301_v19, %v3014_v32  ;;  %v2465_v21 = vpop.f32.mrb[33].mxu0  ;;  %v2471_v23 = vpop.f32.mrb[29].mxu1  ;;  %v1353_v29 = vadd.f32 %v1352_v11, %v3014_v32 }
 0xced   :  { %v1304_v40 = vpop.f32.mrb[34].mxu0  ;;  %v1355_v27 = vpop.f32.mrb[30].mxu1 }
 0xcee   :  { %v1305_v30 = vadd.f32 %v1304_v40, %v3016_v33  ;;  %v2466_v31 = vpop.f32.mrb[35].mxu0  ;;  %v2472_v34 = vpop.f32.mrb[31].mxu1  ;;  %v1371_v35 = vsel %vm442_vm13, %v1302_v20, -inf  ;;  %v1356_v38 = vadd.f32 %v1355_v27, %v3016_v33  ;;  %v1377_v13 = vsel %vm442_vm13, %v1353_v29, -inf }
 0xcef   :  { %1372 = vmax.xlane.f32.xlu1 %v1371_v35  ;;  %1369 = vmax.xlane.f32.xlu0 %v1368_v37 }
 0xcf0   :  { %v1374_v36 = vsel %vm442_vm13, %v1305_v30, -inf  ;;  %v1380_v32 = vsel %vm442_vm13, %v1356_v38, -inf }
 0xcf3   :  { %1375 = vmax.xlane.f32.xlu0 %v1374_v36  ;;  %1378 = vmax.xlane.f32.xlu1 %v1377_v13 }
 0xcf7   :  { %1381 = vmax.xlane.f32.xlu0 %v1380_v32 }
 0xd04   :  { %1452 = vrot.lane.b32.xlu1 %v3161_v22, %s2782_s2 }
 0xd74   :  { %v1361_v39 = vpop.xlane.xlu0 %1360 }
 0xd75   :  { %v1383_v41 = vsub.f32 %v1199_v51, %v1361_v39 }
 0xd76   :  { %v1364_v44 = vpop.xlane.xlu1 %1363 }
 0xd77   :  { %v1391_v15 = vmul.f32 1.442695, %v1383_v41  ;;  %v1384_v50 = vsub.f32 %v1202_v7, %v1364_v44 }
 0xd78   :  { %v1367_v42 = vpop.xlane.xlu0 %1366 }
 0xd79   :  { %2696 = vpow2.f32 %v1391_v15  ;;  %v1393_v33 = vmul.f32 1.442695, %v1384_v50  ;;  %v1385_v52 = vsub.f32 %v1251_v6, %v1367_v42 }
 0xd7b   :  { %2698 = vpow2.f32 %v1393_v33  ;;  %v1395_v45 = vmul.f32 1.442695, %v1385_v52 }
 0xd7c   :  { %v1373_v54 = vpop.xlane.xlu1 %1372  ;;  %v1370_v53 = vpop.xlane.xlu0 %1369 }
 0xd7d   :  { %2700 = vpow2.f32 %v1395_v45  ;;  %v1387_v55 = vsub.f32 %v1302_v20, %v1373_v54  ;;  %v1386_v43 = vsub.f32 %v1254_v17, %v1370_v53 }
 0xd7f   :  { %v1399_v16 = vmul.f32 1.442695, %v1387_v55  ;;  %v1397_v14 = vmul.f32 1.442695, %v1386_v43 }
 0xd80   :  { %v1376_v47 = vpop.xlane.xlu0 %1375  ;;  %v1379_v49 = vpop.xlane.xlu1 %1378 }
 0xd81   :  { %2702 = vpow2.f32 %v1399_v16  ;;  %v1388_v57 = vsub.f32 %v1305_v30, %v1376_v47  ;;  %v1389_v0 = vsub.f32 %v1353_v29, %v1379_v49 }
 0xd82   :  { %2704 = vpow2.f32 %v1397_v14 }
 0xd83   :  { %v2697_v58 = vpop.eup %2696  ;;  %v1401_v59 = vmul.f32 1.442695, %v1388_v57  ;;  %v1403_v60 = vmul.f32 1.442695, %v1389_v0 }
 0xd84   :  { %v1453_v61 = vpop.permute.xlu1 %1452  ;;  %v1382_v62 = vpop.xlane.xlu0 %1381  ;;  %v1407_v63 = vsel %vm442_vm13, %v2697_v58, 0.0 }
 0xd85   :  { %v2699_v46 = vpop.eup %2698  ;;  %2706 = vpow2.f32 %v1401_v59  ;;  %v1390_v51 = vsub.f32 %v1356_v38, %v1382_v62  ;;  %1408 = vadd.xlane.f32.xlu1 %v1407_v63  ;;  %2474 = vmatpush3.bf16.msra.mxu0 %v1453_v61  ;;  %v2637_v61 = vld [vmem:[%s3383_s7 + $0x18] sm:$0xff]  }
 0xd86   :  { %2708 = vpow2.f32 %v1403_v60  ;;  %v1410_v2 = vsel %vm442_vm13, %v2699_v46, 0.0  ;;  %2485 = vmatprep.subr.bf16.mxu0 %v2773_v48 }
 0xd87   :  { %v2701_v3 = vpop.eup %2700  ;;  %v1405_v4 = vmul.f32 1.442695, %v1390_v51  ;;  %1411 = vadd.xlane.f32.xlu0 %v1410_v2 }
 0xd88   :  { %v1413_v5 = vsel %vm442_vm13, %v2701_v3, 0.0 }
 0xd89   :  { %2710 = vpow2.f32 %v1405_v4  ;;  %1414 = vadd.xlane.f32.xlu1 %v1413_v5 }
 0xd8b   :  { %v2703_v6 = vpop.eup %2702 }
 0xd8c   :  { %v2705_v7 = vpop.eup %2704  ;;  %v1419_v8 = vsel %vm442_vm13, %v2703_v6, 0.0 }
 0xd8d   :  { %1420 = vadd.xlane.f32.xlu1 %v1419_v8  ;;  %v1416_v9 = vsel %vm442_vm13, %v2705_v7, 0.0 }
 0xd8e   :  { %1417 = vadd.xlane.f32.xlu0 %v1416_v9 }
 0xd8f   :  { %v2707_v10 = vpop.eup %2706 }
 0xd90   :  { %v2709_v12 = vpop.eup %2708  ;;  %v1422_v17 = vsel %vm442_vm13, %v2707_v10, 0.0 }
 0xd91   :  { %v1425_v18 = vsel %vm442_vm13, %v2709_v12, 0.0 }
 0xd92   :  { %1426 = vadd.xlane.f32.xlu1 %v1425_v18  ;;  %1423 = vadd.xlane.f32.xlu0 %v1422_v17 }
 0xd93   :  { %v2711_v19 = vpop.eup %2710 }
 0xd94   :  { %v1428_v11 = vsel %vm442_vm13, %v2711_v19, 0.0 }
 0xd96   :  { %1429 = vadd.xlane.f32.xlu0 %v1428_v11 }
 0xda3   :  { %1546 = vrot.lane.b32.xlu1 %v3161_v22, %s2783_s22 }
 0xda7   :  { %1593 = vrot.lane.b32.xlu1 %v3161_v22, %s3401_s5 }
 0xdac   :  { %1499 = vrot.lane.b32.xlu0 %v3161_v22, %s3402_s6 }
 0xe12   :  { %v1409_v20 = vpop.xlane.xlu1 %1408 }
 0xe13   :  { %2712 = vrcp.f32 %v1409_v20 }
 0xe14   :  { %v1412_v21 = vpop.xlane.xlu0 %1411 }
 0xe15   :  { %2714 = vrcp.f32 %v1412_v21 }
 0xe16   :  { %v1415_v23 = vpop.xlane.xlu1 %1414 }
 0xe17   :  { %2716 = vrcp.f32 %v1415_v23 }
 0xe1a   :  { %v1421_v40 = vpop.xlane.xlu1 %1420 }
 0xe1b   :  { %v1418_v27 = vpop.xlane.xlu0 %1417 }
 0xe1c   :  { %2718 = vrcp.f32 %v1418_v27 }
 0xe1d   :  { %v2713_v29 = vpop.eup %2712  ;;  %2720 = vrcp.f32 %v1421_v40 }
 0xe1e   :  { %v1439_v35 = vmul.f32 %v2713_v29, %v2697_v58  ;;  %v2636_v58 = vld [vmem:[%s3383_s7 + $0x10] sm:$0xff]   ;;  %s3405_s7 = smov 24  }
 0xe1f   :  { %v2715_v30 = vpop.eup %2714  ;;  %v1427_v31 = vpop.xlane.xlu1 %1426 }
 0xe20   :  { %v1424_v34 = vpop.xlane.xlu0 %1423  ;;  %v1440_v37 = vmul.f32 %v2715_v30, %v2699_v46 }
 0xe21   :  { %2722 = vrcp.f32 %v1424_v34  ;;  %v2717_v13 = vpop.eup %2716 }
 0xe22   :  { %2724 = vrcp.f32 %v1427_v31  ;;  %v1447_v38 = vpack.c.bf16 %v1440_v37, %v1439_v35  ;;  %v1441_v39 = vmul.f32 %v2717_v13, %v2701_v3 }
 0xe23   :  { %v1547_v22 = vpop.permute.xlu1 %1546 }
 0xe24   :  { %v1430_v36 = vpop.xlane.xlu0 %1429  ;;  %2476 = vmatmul.mubr.msk.bf16.vlgmr.msra.gmra.mrb[36].mxu0 %vm442_vm13, %v1447_v38 }
 0xe25   :  { %2726 = vrcp.f32 %v1430_v36  ;;  %2486 = vmatpush3.bf16.msra.mxu0 %v1547_v22  ;;  %2487 = vmatprep.mubr.msk.bf16.mxu0 %vm2774_vm1, %v2773_v48 }
 0xe26   :  { %v2719_v32 = vpop.eup %2718  ;;  %2497 = vmatprep.subr.bf16.mxu0 %v2773_v48 }
 0xe27   :  { %v1442_v41 = vmul.f32 %v2719_v32, %v2705_v7  ;;  %v2721_v15 = vpop.eup %2720  ;;  %v1594_v33 = vpop.permute.xlu1 %1593 }
 0xe28   :  { %v1500_v44 = vpop.permute.xlu0 %1499  ;;  %v1443_v45 = vmul.f32 %v2721_v15, %v2703_v6 }
 0xe29   :  { %2480 = vmatpush3.bf16.msra.mxu1 %v1500_v44  ;;  %v1448_v50 = vpack.c.bf16 %v1442_v41, %v1441_v39 }
 0xe2a   :  { %2491 = vmatprep.subr.bf16.mxu1 %v2773_v48 }
 0xe2b   :  { %v2723_v42 = vpop.eup %2722 }
 0xe2c   :  { %2482 = vmatmul.mubr.msk.bf16.vlgmr.msra.gmra.mrb[32].mxu1 %vm442_vm13, %v1448_v50  ;;  %v2725_v52 = vpop.eup %2724  ;;  %v1444_v54 = vmul.f32 %v2723_v42, %v2707_v10 }
 0xe2d   :  { %2492 = vmatpush3.bf16.msra.mxu1 %v1594_v33  ;;  %2493 = vmatprep.mubr.msk.bf16.mxu1 %vm2774_vm1, %v2773_v48  ;;  %v1445_v43 = vmul.f32 %v2725_v52, %v2709_v12 }
 0xe2e   :  { %2505 = vmatprep.subr.bf16.mxu1 %v2773_v48  ;;  %v1449_v55 = vpack.c.bf16 %v1444_v54, %v1443_v45 }
 0xe2f   :  { %v2727_v53 = vpop.eup %2726 }
 0xe30   :  { %v1446_v16 = vmul.f32 %v2727_v53, %v2711_v19  ;;  %2488 = vmatmul.mubr.msk.bf16.vlgmr.msra.gmra.mrb[40].mxu0 %vm442_vm13, %v1449_v55 }
 0xe31   :  { %2501 = vmatprep.mubr.msk.bf16.mxu0 %vm2774_vm1, %v2773_v48  ;;  %2498 = vmatpush3.bf16.msra.mxu0 %v2636_v58 }
 0xe32   :  { %v1450_v14 = vpack.c.bf16 %v1446_v16, %v1445_v43  ;;  %2499 = vmatprep.subr.bf16.mxu0 %v2773_v48 }
 0xe34   :  { %2494 = vmatmul.mubr.msk.bf16.vlgmr.msra.gmra.mrb[36].mxu1 %vm442_vm13, %v1450_v14 }
 0xe35   :  { %2509 = vmatprep.mubr.msk.bf16.mxu1 %vm2774_vm1, %v2773_v48  ;;  %2500 = vmatpush3.bf16.msra.mxu0 %v2637_v61 }
 0xe36   :  { %2513 = vmatprep.subr.bf16.mxu0 %v2773_v48 }
 0xef7   :  { %v1492_v47 = vpop.f32.mrb[36].mxu0 }
 0xef8   :  { %v2477_v49 = vpop.f32.mrb[37].mxu0 }
 0xef9   :  { %v1495_v57 = vpop.f32.mrb[38].mxu0 }
 0xefa   :  { %v2478_v0 = vpop.f32.mrb[39].mxu0 }
 0xeff   :  { %v1539_v59 = vpop.f32.mrb[32].mxu1 }
 0xf00   :  { %v2483_v60 = vpop.f32.mrb[33].mxu1 }
 0xf01   :  { %v1542_v62 = vpop.f32.mrb[34].mxu1 }
 0xf02   :  { %v2601_v63 = vpack.i.bf16 %v1542_v62, %v1539_v59  ;;  %v2484_v46 = vpop.f32.mrb[35].mxu1 }
 0xf03   :  { %v1586_v51 = vpop.f32.mrb[40].mxu0  ;;  %v2640_v46 = vld [vmem:[%s3386_s10 + $0x20] sm:$0xff]  }
 0xf04   :  { %2602 = vrot.lane.b32.xlu0 %v2601_v63, %s3403_s0  ;;  %v2489_v2 = vpop.f32.mrb[41].mxu0 }
 0xf05   :  { %v1589_v3 = vpop.f32.mrb[42].mxu0  ;;  %v2642_v2 = vld [vmem:[%s3386_s10 + $0x30] sm:$0xff]  }
 0xf06   :  { %v2606_v4 = vpack.i.bf16 %v1589_v3, %v1586_v51  ;;  %v2490_v5 = vpop.f32.mrb[43].mxu0  ;;  %v2641_v51 = vld [vmem:[%s3386_s10 + $0x28] sm:$0xff]   ;;  %v2643_v3 = vld [vmem:[%s3386_s10 + $0x38] sm:$0xff]  }
 0xf07   :  { %v1633_v6 = vpop.f32.mrb[36].mxu1 }
 0xf08   :  { %v2495_v7 = vpop.f32.mrb[37].mxu1  ;;  %2607 = vrot.lane.b32.xlu1 %v2606_v4, %s3404_s17 }
 0xf09   :  { %v1636_v8 = vpop.f32.mrb[38].mxu1 }
 0xf0a   :  { %v2611_v9 = vpack.i.bf16 %v1636_v8, %v1633_v6  ;;  %v2496_v10 = vpop.f32.mrb[39].mxu1 }
 0xf0c   :  { %2612 = vrot.lane.b32.xlu0 %v2611_v9, %s3405_s7 }
 0xf76   :  { %v2603_v12 = vpop.permute.xlu0 %2602 }
 0xf77   :  { %v2605_v17 = vunpack.i.h.bf16 %v2603_v12  ;;  %v2604_v18 = vunpack.i.l.bf16 %v2603_v12 }
 0xf79   :  { %v1665_v23 = vsel %vm240_vm2, %v1495_v57, %v2605_v17  ;;  %v1664_v40 = vsel %vm240_vm2, %v1492_v47, %v2604_v18  ;;  %v2267_v47 = vld [vmem:[%s3384_s8 + $0x1] sm:$0x1]  ;;  %vm1970_vm2 = vcmask 58368  }
 0xf7a   :  { %v2608_v19 = vpop.permute.xlu1 %2607  ;;  %v1762_v49 = vunpack.c.l.bf16 %v2267_v47 }
 0xf7b   :  { %v2610_v11 = vunpack.i.h.bf16 %v2608_v19  ;;  %v2609_v20 = vunpack.i.l.bf16 %v2608_v19 }
 0xf7c   :  { %v1766_v58 = vrot.slane %v1762_v49, %v2938_v26 }
 0xf7d   :  { %v1666_v30 = vsel %vm442_vm13, %v1664_v40, %v2609_v20  ;;  %v1667_v31 = vsel %vm442_vm13, %v1665_v23, %v2610_v11 }
 0xf7e   :  { %v2613_v21 = vpop.permute.xlu0 %2612 }
 0xf7f   :  { %v2615_v27 = vunpack.i.h.bf16 %v2613_v21  ;;  %v2614_v29 = vunpack.i.l.bf16 %v2613_v21 }
 0xf81   :  { %v1669_v34 = vsel %vm752_vm14, %v1667_v31, %v2615_v27  ;;  %v1668_v35 = vsel %vm752_vm14, %v1666_v30, %v2614_v29 }
 0xf82   :  { %v1670_v37 = vpack.c.bf16 %v1669_v34, %v1668_v35 }
 0xf84   :  { %2502 = vmatmul.mubr.msk.bf16.vlgmr.msra.gmra.mrb[44].mxu0 %vm96_vm0, %v1670_v37 }
 0xf85   :  { %2521 = vmatprep.mubr.msk.bf16.mxu0 %vm2774_vm1, %v2773_v48  ;;  %2514 = vmatpush3.bf16.msra.mxu0 %v2640_v46 }
 0xf86   :  { %2515 = vmatprep.subr.bf16.mxu0 %v2773_v48 }
 0xf89   :  { %2516 = vmatpush3.bf16.msra.mxu0 %v2641_v51 }
 0xf8a   :  { %2517 = vmatprep.subr.bf16.mxu0 %v2773_v48 }
 0xf8d   :  { %2518 = vmatpush3.bf16.msra.mxu0 %v2642_v2  ;;  %v2028_v2 = vld [vmem:[%s3388_s12 + $0x18] sm:$0xff] }
 0xf8e   :  { %2519 = vmatprep.subr.bf16.mxu0 %v2773_v48 }
 0xf91   :  { %2520 = vmatpush3.bf16.msra.mxu0 %v2643_v3 }
0x1057   :  { %v1725_v38 = vpop.f32.mrb[44].mxu0 }
0x1058   :  { %v2303_v22 = vpack.c.bf16 %v1725_v38, %v1725_v38  ;;  %v2503_v36 = vpop.f32.mrb[45].mxu0 }
0x1059   :  { %v1728_v13 = vpop.f32.mrb[46].mxu0 }
0x105a   :  { %v3270_v32 = vadd.bf16 %v2303_v22, %v3131_v56  ;;  %v2304_v39 = vpack.c.bf16 %v1728_v13, %v1728_v13  ;;  %v2504_v41 = vpop.f32.mrb[47].mxu0  ;;  %v2638_v56 = vld [vmem:[%s3385_s9 + $0x10] sm:$0xff]  }
0x105b   :  { %2506 = vmatpush3.bf16.msra.mxu1 %v2638_v56 }
0x105c   :  { %v3273_v44 = vadd.bf16 %v2304_v39, %v3134_v1  ;;  %v1744_v15 = vunpack.c.l.bf16 %v3270_v32  ;;  %v2639_v1 = vld [vmem:[%s3385_s9 + $0x18] sm:$0xff]   ;;  %2507 = vmatprep.subr.bf16.mxu1 %v2773_v48 }
0x105e   :  { %v1746_v50 = vmul.f32 %v1744_v15, %v1744_v15  ;;  %v1745_v42 = vunpack.c.l.bf16 %v3273_v44 }
0x105f   :  { %2508 = vmatpush3.bf16.msra.mxu1 %v2639_v1 }
0x1060   :  { %v1748_v33 = vsel %vm96_vm0, %v1746_v50, 0.0  ;;  %v1747_v52 = vmul.f32 %v1745_v42, %v1745_v42  ;;  %2525 = vmatprep.subr.bf16.mxu1 %v2773_v48 }
0x1061   :  { %1749 = vadd.xlane.f32.xlu1 %v1748_v33  ;;  %v57_v33 = vld [vmem:[%s3377_s1] sm:$0x3] }
0x1062   :  { %v1751_v45 = vsel %vm96_vm0, %v1747_v52, 0.0 }
0x1063   :  { %1752 = vadd.xlane.f32.xlu0 %v1751_v45  ;;  %v2789_v45 = vmov 0.0|0.0  }
0x1064   :  { %2559 = vmatprep.subr.bf16.mxu0 %v2789_v45 }
0x10ee   :  { %v1750_v54 = vpop.xlane.xlu1 %1749 }
0x10ef   :  { %v1754_v53 = vmul.f32 0.03125, %v1750_v54 }
0x10f0   :  { %v1753_v55 = vpop.xlane.xlu0 %1752 }
0x10f1   :  { %v1756_v43 = vadd.f32 1e-06, %v1754_v53  ;;  %v1755_v16 = vmul.f32 0.03125, %v1753_v55 }
0x10f3   :  { %2728 = vrsqrt.f32 %v1756_v43  ;;  %v1757_v14 = vadd.f32 1e-06, %v1755_v16  ;;  %v1943_v16 = vld [vmem:[%s3387_s11] sm:$0x1] }
0x10f4   :  { %v1962_v49 = vunpack.c.l.bf16 %v1943_v16 }
0x10f5   :  { %2730 = vrsqrt.f32 %v1757_v14  ;;  %v1975_v14 = vcvt.s32.f32 %v3007_v28  ;;  %v2025_v28 = vld [vmem:[%s3388_s12] sm:$0xff] }
0x10f6   :  { %v2554_v51 = vpack.c.bf16 %v2026_v24, %v2025_v28 }
0x10fd   :  { %v2729_v57 = vpop.eup %2728 }
0x10fe   :  { %v1760_v0 = vmul.f32 %v2729_v57, %v1744_v15 }
0x10ff   :  { %v2731_v59 = vpop.eup %2730 }
0x1100   :  { %v1761_v60 = vmul.f32 %v2731_v59, %v1745_v42  ;;  %v1767_v61 = vmul.f32 %v1766_v58, %v1760_v0 }
0x1102   :  { %v1768_v62 = vmul.f32 %v1766_v58, %v1761_v60  ;;  %v1966_v58 = vrot.slane %v1962_v49, %v2938_v26  ;;  %v2027_v26 = vld [vmem:[%s3388_s12 + $0x10] sm:$0xff] }
0x1103   :  { %v2557_v3 = vpack.c.bf16 %v2028_v2, %v2027_v26 }
0x1104   :  { %v1769_v63 = vpack.c.bf16 %v1768_v62, %v1767_v61 }
0x1106   :  { %2510 = vmatmul.mubr.msk.bf16.vlgmr.msra.gmra.mrb[40].mxu1 %vm96_vm0, %v1769_v63 }
0x1107   :  { %2527 = vmatprep.mubr.msk.bf16.mxu1 %vm2774_vm1, %v2773_v48 }
0x11d9   :  { %v1824_v4 = vpop.f32.mrb[40].mxu1 }
0x11da   :  { %1847 = vrot.lane.b32.xlu0 %v1824_v4, %s2782_s2  ;;  %v2511_v5 = vpop.f32.mrb[41].mxu1  ;;  %v2275_v8 = vmul.f32 -1.442695, %v1824_v4 }
0x11db   :  { %v1827_v6 = vpop.f32.mrb[42].mxu1 }
0x11dc   :  { %1849 = vrot.lane.b32.xlu1 %v1827_v6, %s2782_s2  ;;  %v2512_v7 = vpop.f32.mrb[43].mxu1  ;;  %v2276_v9 = vmul.f32 -1.442695, %v1827_v6  ;;  %2732 = vpow2.f32 %v2275_v8  ;;  %v2111_v8 = vld [vmem:[%s3390_s14 + $0x8] sm:$0xff] }
0x11de   :  { %2734 = vpow2.f32 %v2276_v9  ;;  %v2112_v9 = vld [vmem:[%s3390_s14 + $0x10] sm:$0xff] }
0x11e6   :  { %v2733_v10 = vpop.eup %2732 }
0x11e7   :  { %v1837_v17 = vadd.f32 1.0, %v2733_v10 }
0x11e8   :  { %v2735_v12 = vpop.eup %2734 }
0x11e9   :  { %v1838_v18 = vadd.f32 1.0, %v2735_v12  ;;  %2736 = vrcp.f32 %v1837_v17  ;;  %v2113_v12 = vld [vmem:[%s3390_s14 + $0x18] sm:$0xff] }
0x11ea   :  { %v2563_v17 = vpack.c.bf16 %v2113_v12, %v2112_v9 }
0x11eb   :  { %2738 = vrcp.f32 %v1838_v18  ;;  %v2295_v18 = vld [vmem:[%s3389_s13] ss:$0 sm:$0xff] }
0x11f3   :  { %v2737_v19 = vpop.eup %2736 }
0x11f4   :  { %v1843_v21 = vmul.f32 %v2737_v19, %v1824_v4 }
0x11f5   :  { %v2739_v11 = vpop.eup %2738 }
0x11f6   :  { %v1844_v23 = vmul.f32 %v2739_v11, %v1827_v6 }
0x124c   :  { %v1848_v20 = vpop.permute.xlu0 %1847 }
0x124d   :  { %v1853_v27 = vmul.f32 %v1848_v20, %v1843_v21 }
0x124e   :  { %v1850_v40 = vpop.permute.xlu1 %1849 }
0x124f   :  { %v1854_v29 = vmul.f32 %v1850_v40, %v1844_v23  ;;  %v2297_v23 = vld [vmem:[%s3391_s15] ss:$0 sm:$0xff] }
0x1251   :  { %v1855_v30 = vpack.c.bf16 %v1854_v29, %v1853_v27 }
0x1253   :  { %2522 = vmatmul.mubr.msk.bf16.vlgmr.msra.gmra.mrb[48].mxu0 %vm970_vm15, %v1855_v30 }
0x1254   :  { %2550 = vmatprep.mubr.msk.f32.mxu0 %vm2774_vm1, %v2773_v48 }
0x1326   :  { %v1926_v31 = vpop.f32.mrb[48].mxu0 }
0x1327   :  { %v2305_v34 = vpack.c.bf16 %v1926_v31, %v1926_v31  ;;  %v2523_v35 = vpop.f32.mrb[49].mxu0 }
0x1328   :  { %v1929_v37 = vpop.f32.mrb[50].mxu0 }
0x1329   :  { %v1941_v38 = vadd.bf16 %v2305_v34, %v3270_v32  ;;  %v2306_v22 = vpack.c.bf16 %v1929_v37, %v1929_v37  ;;  %v2524_v36 = vpop.f32.mrb[51].mxu0  ;;  %v1971_v32 = vsel %vm1970_vm2, %v57_v33, 0.0 }
0x132b   :  { %v1944_v13 = vunpack.c.l.bf16 %v1941_v38  ;;  %v1942_v39 = vadd.bf16 %v2306_v22, %v3273_v44 }
0x132d   :  { %v1945_v41 = vunpack.c.l.bf16 %v1942_v39  ;;  %v1946_v15 = vmul.f32 %v1944_v13, %v1944_v13 }
0x132f   :  { %v1948_v50 = vsel %vm96_vm0, %v1946_v15, 0.0  ;;  %v1947_v42 = vmul.f32 %v1945_v41, %v1945_v41 }
0x1330   :  { %1949 = vadd.xlane.f32.xlu1 %v1948_v50 }
0x1331   :  { %v1951_v52 = vsel %vm96_vm0, %v1947_v42, 0.0 }
0x1332   :  { %1952 = vadd.xlane.f32.xlu0 %v1951_v52 }
0x1336   :  { %1972 = vadd.xlane.f32.xlu0 %v1971_v32 }
0x13bd   :  { %v1950_v56 = vpop.xlane.xlu1 %1949 }
0x13be   :  { %v1954_v44 = vmul.f32 0.03125, %v1950_v56 }
0x13bf   :  { %v1953_v1 = vpop.xlane.xlu0 %1952 }
0x13c0   :  { %v1956_v54 = vadd.f32 1e-06, %v1954_v44  ;;  %v1955_v53 = vmul.f32 0.03125, %v1953_v1 }
0x13c2   :  { %2740 = vrsqrt.f32 %v1956_v54  ;;  %v1957_v55 = vadd.f32 1e-06, %v1955_v53 }
0x13c3   :  { %v1973_v43 = vpop.xlane.xlu0 %1972 }
0x13c4   :  { %2742 = vrsqrt.f32 %v1957_v55  ;;  %v2292_v47 = vadd.f32 -1.0, %v1973_v43 }
0x13c6   :  { %vm1977_vm4 = vcmp.eq.f32.partialorder %v1975_v14, %v2292_v47 }
0x13c7   :  { %vm1978_vm5 = vmand %vm1974_vm3, %vm1977_vm4 }
0x13c8   :  { %v2293_v61 = vsel %vm1978_vm5, 1.0, %v2773_v48 }
0x13c9   :  { %v1981_v46 = vpack.c.bf16 %v2293_v61, %v2293_v61 }
0x13cc   :  { %v2741_v57 = vpop.eup %2740 }
0x13cd   :  { %v1960_v0 = vmul.f32 %v2741_v57, %v1944_v13 }
0x13ce   :  { %v2743_v59 = vpop.eup %2742 }
0x13cf   :  { %v1961_v60 = vmul.f32 %v2743_v59, %v1945_v41  ;;  %v1967_v62 = vmul.f32 %v1966_v58, %v1960_v0 }
0x13d1   :  { %v1968_v63 = vmul.f32 %v1966_v58, %v1961_v60 }
0x13d3   :  { %v1969_v25 = vpack.c.bf16 %v1968_v63, %v1967_v62 }
0x13d5   :  { %2526 = vmatpush3.bf16.msra.mxu1 %v1969_v25 }
0x13d6   :  { %2553 = vmatprep.subr.bf16.mxu1 %v2789_v45 }
0x13d8   :  { %2528 = vmatmul.mubr.msk.bf16.vlgmr.msra.gmra.mrb[44].mxu1 %vm442_vm13, %v1981_v46 }
0x13d9   :  { %2555 = vmatpush3.bf16.msra.mxu1 %v2554_v51  ;;  %2539 = vmatprep.mubr.msk.f32.mxu1 %vm2774_vm1, %v2773_v48  ;;  %v2110_v48 = vld [vmem:[%s3390_s14] sm:$0xff]  ;;  %s2790_s14 = smov [#allocation2]   ;;  %vm2194_vm1 = vcmask 25600  }
0x13da   :  { %2556 = vmatprep.subr.bf16.mxu1 %v2789_v45  ;;  %v2560_v10 = vpack.c.bf16 %v2111_v8, %v2110_v48  ;;  %s2202_s26 = sshll.u32 %s2790_s14, 4  ;;  %s2203_s26 = int_to_ptr.vmem [resolvable:$true] %s2202_s26 }
0x13db   :  { %s2746_s13 = scalar_lea.vmem %s2203_s26, 32  ;;  %p2751_p1 = scmp.lt.s32.totalorder %s2203_s26, %s2203_s26 }
0x13dc   :  { %2561 = vmatpush3.bf16.msra.mxu0 %v2560_v10  ;;  %p2747_p0 = scmp.ne.s32.totalorder %s2203_s26, %s2746_s13  ;;  %p2752_p2 = scmp.lt.s32.totalorder %s2746_s13, %s2746_s13 }
0x13dd   :  { %2558 = vmatpush3.bf16.msra.mxu1 %v2557_v3  ;;  %2562 = vmatprep.subr.bf16.mxu0 %v2789_v45 }
0x13de   :  { %p2753_p3 = por %p2752_p2, %p2751_p1 }
0x13e0   :  { %2564 = vmatpush3.bf16.msra.mxu0 %v2563_v17  ;;  %p2754_p4 = pnand %p2753_p3, %p2747_p0 }
0x14ab   :  { %v2019_v4 = vpop.f32.mrb[44].mxu1 }
0x14ac   :  { %v2529_v5 = vpop.f32.mrb[45].mxu1  ;;  %2540 = vmatmul.mubr.msk.f32.vlgmr.msra.gmra.mrb[48].mxu1 %vm96_vm0, %v2019_v4 }
0x14ad   :  { %v2022_v6 = vpop.f32.mrb[46].mxu1 }
0x14ae   :  { %v2530_v7 = vpop.f32.mrb[47].mxu1 }
0x157f   :  { %v2105_v19 = vpop.f32.mrb[48].mxu1 }
0x1580   :  { %v2106_v11 = vadd.f32 %v2295_v18, %v2105_v19  ;;  %v2541_v20 = vpop.f32.mrb[49].mxu1 }
0x1582   :  { %2744 = vtanh.f32 %v2106_v11 }
0x158c   :  { %v2745_v21 = vpop.eup %2744 }
0x158d   :  { %2551 = vmatmul.mubr.msk.f32.vlgmr.msra.gmra.mrb[52].mxu0 %vm96_vm0, %v2745_v21 }
0x1660   :  { %v2190_v40 = vpop.f32.mrb[52].mxu0 }
0x1661   :  { %v2191_v27 = vadd.f32 %v2297_v23, %v2190_v40  ;;  %v2552_v29 = vpop.f32.mrb[53].mxu0 }
0x1663   :  { %2195 = vst.msk [vmem:[#allocation2] sm:$0x3] %vm2194_vm1, %v2191_v27 }
0x1664   :  { %2757 = shalt.err (!%p2754_p4)
}
0x1665   :  { %s2758_s10 = scalar_lea.hbm %s3392_s16, 32 }
0x1666   :  { %p2759_p5 = scmp.ne.s32.totalorder %s3392_s16, %s2758_s10  ;;  %p2762_p6 = scmp.lt.u32.totalorder %s2758_s10, %s3392_s16 }
0x1668   :  { %p2764_p7 = pnand %p2762_p6, %p2759_p5 }
0x166a   :  { %2767 = shalt.err (!%p2764_p7)
}
0x166b   :  { %2205 = dma.vmem_to_hbm [thread:$0]  %s2203_s26, 32, %s3392_s16, [#allocation3]  }
0x166c   :  { %2768 = dma.done.wait [#allocation3], 32  }
0x166d   :  { %2769 = vsyncadd [#allocation3], 4294967264 }
0x166e   :  { %2209 = vsyncpa [#allocation3], 1 }

</bundles_post_ra>
